<compile_context>
chip_gen: v7x
topology: tpu7x:2x2x1
jax: 0.10.0
libtpu: 0.0.40
codegen_flags: <defaults>
</compile_context>

<pallas_src>
import jax
import jax.numpy as jnp
from jax.experimental import pallas as pl
from jax.experimental.pallas import tpu as pltpu

# ----------------------------- configuration -------------------------------
FEAT = 40          # acoustic feature dim (fixed to 40 in the PyTorch module)
HIDDEN = 64        # GRU / LSTM hidden size
PRJ = 128          # projection size (lane aligned)
VOCAB = 128        # vocab size (lane aligned)
EMB = 32           # LM embedding size
AM_LAYERS = 3
LM_LAYERS = 2
BLANK = 0
BN_EPS = 1e-5


def _round_up(x, m):
    return (x + m - 1) // m * m


def _ceil_div(a, b):
    return -(-a // b)


# ------------------------- Pallas kernel: matmul -----------------------------
def _mm_kernel(a_ref, b_ref, bias_ref, o_ref):
    # a: (tm, K) f32, b: (K, N) bf16, bias: (1, N) f32, o: (tm, N) out_dtype
    acc = jnp.dot(a_ref[...].astype(jnp.bfloat16), b_ref[...],
                  preferred_element_type=jnp.float32)
    o_ref[...] = (acc + bias_ref[...]).astype(o_ref.dtype)


def _choose_m_tiles(M):
    """Pick (num_m, tm, Mp) with bounded padding overshoot."""
    if M > 512:
        num_m = _ceil_div(M, 512)
        tm = _round_up(_ceil_div(M, num_m), 16)
    elif M >= 64 and M % 32 == 0:
        num_m, tm = 2, M // 2       # >= 2 parallel units for dual-TC parts
    else:
        num_m, tm = 1, M            # full-dim block, no padding needed
    return num_m, tm, num_m * tm


def pallas_matmul(a, b, bias=None, out_dtype=jnp.float32):
    """(M, K) @ (K, N) [+ bias] -> (M, N).  bf16 MXU operands, f32 accumulate.

    K and N are never padded (full-dim blocks); M is only padded for large M.
    """
    M, K = a.shape
    K2, N = b.shape
    assert K == K2
    num_m, tm, Mp = _choose_m_tiles(M)

    a_in = a if Mp == M else jnp.pad(a, ((0, Mp - M), (0, 0)))
    b_bf = b.astype(jnp.bfloat16)
    if bias is None:
        bias2 = jnp.zeros((1, N), jnp.float32)
    else:
        bias2 = bias.reshape(1, N).astype(jnp.float32)

    out = pl.pallas_call(
        _mm_kernel,
        grid=(num_m,),
        in_specs=[pl.BlockSpec((tm, K), lambda i: (i, 0)),
                  pl.BlockSpec((K, N), lambda i: (0, 0)),
                  pl.BlockSpec((1, N), lambda i: (0, 0))],
        out_specs=pl.BlockSpec((tm, N), lambda i: (i, 0)),
        out_shape=jax.ShapeDtypeStruct((Mp, N), out_dtype),
        compiler_params=pltpu.CompilerParams(
            dimension_semantics=("parallel",)),
    )(a_in, b_bf, bias2)
    return out if Mp == M else out[:M]


# ------------------------- Pallas kernel: joint ------------------------------
def _joint_kernel(x_ref, y_ref, w_ref, b_ref, o_ref):
    # x: (1, tT, H) bf16, y: (1, U8, H) bf16, w: (H, V) bf16, b: (1, V) f32
    # o: (1, tT, U, V) out_dtype (U <= U8, U8 multiple of 8)
    tT, H = x_ref.shape[1], x_ref.shape[2]
    U8 = y_ref.shape[1]
    V = w_ref.shape[1]
    U = o_ref.shape[2]

    x = x_ref[0]                                            # (tT, H) bf16
    y = y_ref[0]                                            # (U8, H) bf16
    # broadcast add + ReLU in bf16 (halves VALU work / footprint on v6e/v7x),
    # tile-aligned reshape (U8 is a multiple of the 8-row sublane tile).
    z = jnp.maximum(x[:, None, :] + y[None, :, :], 0).reshape(tT * U8, H)
    logits = jnp.dot(z, w_ref[...],
                     preferred_element_type=jnp.float32) + b_ref[...]
    # log-softmax kept in f32, vectorized over the whole slab
    m = jnp.max(logits, axis=-1, keepdims=True)
    lse = jnp.log(jnp.sum(jnp.exp(logits - m), axis=-1, keepdims=True)) + m
    logp = (logits - lse).reshape(tT, U8, V)
    # exact-U store (drops the padded label rows in VMEM, not via an HBM slice)
    o_ref[...] = logp[:, :U, :].astype(o_ref.dtype).reshape(1, tT, U, V)


def pallas_joint(xs, ys, w, b, out_dtype=jnp.bfloat16):
    """log_softmax(relu(xs[:,:,None]+ys[:,None]) @ w + b) -> (N, T, U, V)."""
    N, T, H = xs.shape
    _, U, _ = ys.shape
    V = w.shape[1]
    assert H % 128 == 0 and V % 128 == 0
    U8 = _round_up(U, 8)

    max_rows = 4096                     # keeps per-block VMEM well under limits
    if T * U8 <= max_rows:
        tT, Tp = T, T                   # single full-dim time block, no padding
    else:
        tT = max(16, (max_rows // U8) // 16 * 16)
        Tp = _round_up(T, tT)

    xs_b = xs.astype(jnp.bfloat16)
    if Tp != T:
        xs_b = jnp.pad(xs_b, ((0, 0), (0, Tp - T), (0, 0)))
    ys_b = ys.astype(jnp.bfloat16)
    if U8 != U:
        ys_b = jnp.pad(ys_b, ((0, 0), (0, U8 - U), (0, 0)))
    w_b = w.astype(jnp.bfloat16)
    b2 = b.reshape(1, V).astype(jnp.float32)

    out = pl.pallas_call(
        _joint_kernel,
        grid=(N, Tp // tT),
        in_specs=[pl.BlockSpec((1, tT, H), lambda n, t: (n, t, 0)),
                  pl.BlockSpec((1, U8, H), lambda n, t: (n, 0, 0)),
                  pl.BlockSpec((H, V), lambda n, t: (0, 0)),
                  pl.BlockSpec((1, V), lambda n, t: (0, 0))],
        out_specs=pl.BlockSpec((1, tT, U, V), lambda n, t: (n, t, 0, 0)),
        out_shape=jax.ShapeDtypeStruct((N, Tp, U, V), out_dtype),
        compiler_params=pltpu.CompilerParams(
            dimension_semantics=("parallel", "parallel")),
    )(xs_b, ys_b, w_b, b2)
    return out if Tp == T else out[:, :T]


# ---------------- Pallas kernel: resident-weight GRU recurrence --------------
def _bigru_step_kernel(xif_ref, xib_ref, mf_ref, mb_ref,
                       whf_ref, whb_ref, bhf_ref, bhb_ref,
                       of_ref, ob_ref, hf_ref, hb_ref):
    # xi*: (1, N, 3H) f32 input gates, m*: (1, N, 1) f32 validity,
    # wh*: (H, 3H) f32 (resident), bh*: (1, 3H) f32, o*: (1, N, H) f32,
    # h*: (N, H) f32 carry scratch.
    @pl.when(pl.program_id(0) == 0)
    def _():
        hf_ref[...] = jnp.zeros_like(hf_ref)
        hb_ref[...] = jnp.zeros_like(hb_ref)

    H = hf_ref.shape[1]

    def one_dir(xi_ref, m_ref, wh_ref, bh_ref, o_ref, h_ref):
        h = h_ref[...]                                       # (N, H)
        xg = xi_ref[0]                                       # (N, 3H)
        hg = jnp.dot(h, wh_ref[...],
                     preferred_element_type=jnp.float32) + bh_ref[...]
        r = jax.nn.sigmoid(xg[:, 0:H] + hg[:, 0:H])
        z = jax.nn.sigmoid(xg[:, H:2 * H] + hg[:, H:2 * H])
        n = jnp.tanh(xg[:, 2 * H:3 * H] + r * hg[:, 2 * H:3 * H])
        h_new = (1.0 - z) * n + z * h
        valid = m_ref[0]                                     # (N, 1)
        h_ref[...] = valid * h_new + (1.0 - valid) * h       # hold at padding
        o_ref[...] = (valid * h_new).reshape(o_ref.shape)    # zero at padding

    one_dir(xif_ref, mf_ref, whf_ref, bhf_ref, of_ref, hf_ref)
    one_dir(xib_ref, mb_ref, whb_ref, bhb_ref, ob_ref, hb_ref)


def pallas_bigru_scan(xi_f, xi_b, mask, wh_f_t, wh_b_t, bh_f, bh_b):
    """Bidirectional GRU recurrence over T with weights resident in VMEM."""
    T, N, H3 = xi_f.shape
    H = H3 // 3
    fwd3 = lambda t: (t, 0, 0)
    bwd3 = lambda t: (T - 1 - t, 0, 0)
    cst2 = lambda t: (0, 0)

    f, b = pl.pallas_call(
        _bigru_step_kernel,
        grid=(T,),
        in_specs=[pl.BlockSpec((1, N, H3), fwd3),
                  pl.BlockSpec((1, N, H3), bwd3),
                  pl.BlockSpec((1, N, 1), fwd3),
                  pl.BlockSpec((1, N, 1), bwd3),
                  pl.BlockSpec((H, H3), cst2),
                  pl.BlockSpec((H, H3), cst2),
                  pl.BlockSpec((1, H3), cst2),
                  pl.BlockSpec((1, H3), cst2)],
        out_specs=[pl.BlockSpec((1, N, H), fwd3),
                   pl.BlockSpec((1, N, H), bwd3)],
        out_shape=[jax.ShapeDtypeStruct((T, N, H), jnp.float32),
                   jax.ShapeDtypeStruct((T, N, H), jnp.float32)],
        scratch_shapes=[pltpu.VMEM((N, H), jnp.float32),
                        pltpu.VMEM((N, H), jnp.float32)],
        compiler_params=pltpu.CompilerParams(
            dimension_semantics=("arbitrary",)),       # sequential (carry)
    )(xi_f, xi_b, mask, mask, wh_f_t, wh_b_t,
      bh_f.reshape(1, H3), bh_b.reshape(1, H3))
    return f, b


# ---------------- Pallas kernel: resident-weight LSTM recurrence -------------
def _lstm_step_kernel(xi_ref, m_ref, wh_ref, bh_ref, o_ref, h_ref, c_ref):
    # xi: (1, N, 4H) f32, m: (1, N, 1) f32, wh: (H, 4H) f32, bh: (1, 4H) f32,
    # o: (1, N, H) f32, h/c: (N, H) f32 carry scratch.
    @pl.when(pl.program_id(0) == 0)
    def _():
        h_ref[...] = jnp.zeros_like(h_ref)
        c_ref[...] = jnp.zeros_like(c_ref)

    H = h_ref.shape[1]
    h = h_ref[...]
    c = c_ref[...]
    g = xi_ref[0] + jnp.dot(h, wh_ref[...],
                            preferred_element_type=jnp.float32) + bh_ref[...]
    gi = jax.nn.sigmoid(g[:, 0:H])
    gf = jax.nn.sigmoid(g[:, H:2 * H])
    gg = jnp.tanh(g[:, 2 * H:3 * H])
    go = jax.nn.sigmoid(g[:, 3 * H:4 * H])
    c_new = gf * c + gi * gg
    h_new = go * jnp.tanh(c_new)
    valid = m_ref[0]                                         # (N, 1)
    h_ref[...] = valid * h_new + (1.0 - valid) * h
    c_ref[...] = valid * c_new + (1.0 - valid) * c
    o_ref[...] = (valid * h_new).reshape(o_ref.shape)


def pallas_lstm_scan(xi, mask, wh_t, bh):
    T, N, H4 = xi.shape
    H = H4 // 4
    idx3 = lambda t: (t, 0, 0)
    cst2 = lambda t: (0, 0)
    out = pl.pallas_call(
        _lstm_step_kernel,
        grid=(T,),
        in_specs=[pl.BlockSpec((1, N, H4), idx3),
                  pl.BlockSpec((1, N, 1), idx3),
                  pl.BlockSpec((H, H4), cst2),
                  pl.BlockSpec((1, H4), cst2)],
        out_specs=pl.BlockSpec((1, N, H), idx3),
        out_shape=jax.ShapeDtypeStruct((T, N, H), jnp.float32),
        scratch_shapes=[pltpu.VMEM((N, H), jnp.float32),
                        pltpu.VMEM((N, H), jnp.float32)],
        compiler_params=pltpu.CompilerParams(
            dimension_semantics=("arbitrary",)),
    )(xi, mask, wh_t, bh.reshape(1, H4))
    return out


# ----------------------------- conv / batchnorm -----------------------------
def conv2d(x, w, stride, padding):
    """Conv2d (no bias), NCHW / OIHW — avoids materialized im2col patches."""
    return jax.lax.conv_general_dilated(
        x, w, window_strides=stride,
        padding=[(padding[0], padding[0]), (padding[1], padding[1])],
        dimension_numbers=('NCHW', 'OIHW', 'NCHW'))


def batchnorm2d_train(x, gamma, beta):
    """BatchNorm2d in training mode (batch statistics, biased variance)."""
    mean = jnp.mean(x, axis=(0, 2, 3), keepdims=True)
    var = jnp.mean((x - mean) ** 2, axis=(0, 2, 3), keepdims=True)
    xh = (x - mean) / jnp.sqrt(var + BN_EPS)
    return xh * gamma.reshape(1, -1, 1, 1) + beta.reshape(1, -1, 1, 1)


def mask_conv(params, x, lengths):
    """MaskConv forward: conv stack with padded-time masking (dropout=0)."""
    # conv1: k=(21,11) s=(2,2) p=(10,5)  -> time decreases
    x = conv2d(x, params['conv1_w'], (2, 2), (10, 5))
    lengths2 = (lengths - 1) // 2 + 1
    T1 = x.shape[3]
    mask = jnp.arange(T1)[None, :] >= lengths2[:, None]      # True at padded steps
    mask4 = mask[:, None, None, :]

    def apply_mask(v):
        return jnp.where(mask4, 0.0, v)

    x = apply_mask(x)
    x = apply_mask(batchnorm2d_train(x, params['bn1_g'], params['bn1_b']))
    x = apply_mask(jnp.maximum(x, 0.0))
    # conv2: k=(11,11) s=(2,1) p=(5,5)  -> time unchanged
    x = apply_mask(conv2d(x, params['conv2_w'], (2, 1), (5, 5)))
    x = apply_mask(batchnorm2d_train(x, params['bn2_g'], params['bn2_b']))
    x = apply_mask(jnp.maximum(x, 0.0))

    n, c, d, t = x.shape
    x = x.reshape(n, c * d, t)
    x = jnp.transpose(x, (2, 0, 1))                          # (T', N, C*D)
    return x, lengths2


# ----------------------------- recurrent layers -----------------------------
def _valid_mask(T, lengths):
    return (jnp.arange(T)[:, None] < lengths[None, :]
            ).astype(jnp.float32)[:, :, None]                # (T, N, 1)


def bigru_layer(x, lengths, lp):
    """Bidirectional GRU layer; fwd+bwd input projections fused in one matmul,
    recurrence runs in a resident-weight Pallas kernel."""
    T, N, I = x.shape
    w_cat = jnp.concatenate([lp['fwd']['w_ih'], lp['bwd']['w_ih']], axis=0)  # (6H, I)
    b_cat = jnp.concatenate([lp['fwd']['b_ih'], lp['bwd']['b_ih']], axis=0)  # (6H,)
    xi = pallas_matmul(x.reshape(T * N, I), w_cat.T, bias=b_cat)             # (T*N, 6H)
    xi = xi.reshape(T, N, 6 * HIDDEN)
    xi_f, xi_b = jnp.split(xi, 2, axis=-1)                   # (T, N, 3H) each
    mask = _valid_mask(T, lengths)
    f, b = pallas_bigru_scan(xi_f, xi_b, mask,
                             lp['fwd']['w_hh'].T, lp['bwd']['w_hh'].T,
                             lp['fwd']['b_hh'], lp['bwd']['b_hh'])
    return jnp.concatenate([f, b], axis=-1)                  # (T, N, 2H)


def lstm_layer(x, lengths, lp):
    T, N, I = x.shape
    H = lp['w_hh'].shape[1]
    xi = pallas_matmul(x.reshape(T * N, I), lp['w_ih'].T, bias=lp['b_ih'])
    xi = xi.reshape(T, N, 4 * H)
    mask = _valid_mask(T, lengths)
    return pallas_lstm_scan(xi, mask, lp['w_hh'].T, lp['b_hh'])   # (T, N, H)


# ----------------------------- model forward --------------------------------
def forward_acoustic(params, xs, xn):
    x, lengths = mask_conv(params, xs, xn)                   # (T', N, 320)
    out = x
    for l in range(AM_LAYERS):
        out = bigru_layer(out, lengths, params['gru'][l])
    f, b = jnp.split(out, 2, axis=-1)
    summed = f + b                                           # (T', N, HIDDEN)
    Tm, Nn, _ = summed.shape
    # prj emits bf16 directly -> halves its writeback and feeds the joint
    # without an extra cast pass.
    data = pallas_matmul(summed.reshape(Tm * Nn, HIDDEN), params['am_prj_w'].T,
                         out_dtype=jnp.bfloat16)
    data = data.reshape(Tm, Nn, PRJ)
    # Static padded extent (no int(max(lengths)) host sync); pads are zeros,
    # matching pad_packed_sequence.
    return jnp.transpose(data, (1, 0, 2)), lengths           # (N, T', PRJ)


def forward_language(params, ys, yn):
    U, N = ys.shape
    init = jnp.zeros((1, N), jnp.int32)
    tokens = jnp.concatenate([init, ys.astype(jnp.int32)], axis=0)   # (U+1, N)
    emb = params['emb'][tokens]                               # (U+1, N, EMB)
    lengths = yn + 1
    out = emb
    for l in range(LM_LAYERS):
        out = lstm_layer(out, lengths, params['lstm'][l])
    Tm, Nn, _ = out.shape
    data = pallas_matmul(out.reshape(Tm * Nn, HIDDEN), params['lm_prj_w'].T,
                         out_dtype=jnp.bfloat16)
    data = data.reshape(Tm, Nn, PRJ)
    return jnp.transpose(data, (1, 0, 2))                     # (N, U+1, PRJ)


def transducer_forward(params, xs, ys, xn, yn):
    xs_enc, xn_out = forward_acoustic(params, xs, xn)         # (N, T', PRJ) bf16
    ys_enc = forward_language(params, ys, yn)                 # (N, U+1, PRJ) bf16
    zs = pallas_joint(xs_enc, ys_enc, params['joint_w'].T, params['joint_b'])
    return zs, xs_enc, xn_out


# ----------------------------- parameter init -------------------------------
def init_params(key):
    keys = iter(jax.random.split(key, 128))

    def nrm(shape, scale=0.1):
        return scale * jax.random.normal(next(keys), shape, jnp.float32)

    p = {}
    p['conv1_w'] = nrm((32, 1, 21, 11))
    p['bn1_g'] = jnp.ones((32,), jnp.float32)
    p['bn1_b'] = jnp.zeros((32,), jnp.float32)
    p['conv2_w'] = nrm((32, 32, 11, 11))
    p['bn2_g'] = jnp.ones((32,), jnp.float32)
    p['bn2_b'] = jnp.zeros((32,), jnp.float32)

    conv_feat = 32 * (((FEAT + 20 - 20 - 1) // 2 + 1 + 10 - 10 - 1) // 2 + 1)  # 320
    gru = []
    in_size = conv_feat
    for _ in range(AM_LAYERS):
        layer = {}
        for d in ('fwd', 'bwd'):
            layer[d] = dict(w_ih=nrm((3 * HIDDEN, in_size)),
                            w_hh=nrm((3 * HIDDEN, HIDDEN)),
                            b_ih=nrm((3 * HIDDEN,), 0.05),
                            b_hh=nrm((3 * HIDDEN,), 0.05))
        gru.append(layer)
        in_size = 2 * HIDDEN
    p['gru'] = gru
    p['am_prj_w'] = nrm((PRJ, HIDDEN))                        # Linear(hidden, prj, bias=False)

    emb = nrm((VOCAB, EMB))
    p['emb'] = emb.at[BLANK].set(0.0)                         # padding_idx = blank
    lstm = []
    in_size = EMB
    for _ in range(LM_LAYERS):
        lstm.append(dict(w_ih=nrm((4 * HIDDEN, in_size)),
                         w_hh=nrm((4 * HIDDEN, HIDDEN)),
                         b_ih=nrm((4 * HIDDEN,), 0.05),
                         b_hh=nrm((4 * HIDDEN,), 0.05)))
        in_size = HIDDEN
    p['lstm'] = lstm
    p['lm_prj_w'] = nrm((PRJ, HIDDEN))

    p['joint_w'] = nrm((VOCAB, PRJ))                          # Transducer.fc Linear(prj, vocab)
    p['joint_b'] = nrm((VOCAB,), 0.05)
    return p


# ----------------------------- main -----------------------------------------
if __name__ == "__main__":
    key = jax.random.PRNGKey(0)
    pkey, d1, d2 = jax.random.split(key, 3)
    params = init_params(pkey)

    N, T, U = 2, 16, 6
    xs = jax.random.normal(d1, (N, 1, FEAT, T), jnp.float32)      # NCHW: (N, 1, 40, T)
    ys = jax.random.randint(d2, (U, N), 1, VOCAB, dtype=jnp.int32)
    xn = jnp.array([16, 11], jnp.int32)                           # sorted desc (enforce_sorted=True)
    yn = jnp.array([6, 4], jnp.int32)
    ys = jnp.where(jnp.arange(U)[:, None] < yn[None, :], ys, BLANK)

    fwd = jax.jit(transducer_forward)                             # fully jittable
    zs, xs_enc, xn_out = fwd(params, xs, ys, xn, yn)
    jax.block_until_ready((zs, xs_enc, xn_out))

    T_out = (T - 1) // 2 + 1
    assert zs.shape == (N, T_out, U + 1, VOCAB), zs.shape
    assert xs_enc.shape == (N, T_out, PRJ), xs_enc.shape

    zs32 = zs.astype(jnp.float32)
    assert bool(jnp.all(jnp.isfinite(zs32)))
    # log_softmax sanity: rows sum to ~1 in prob space (softmax computed in
    # f32 inside the kernel; outputs stored in bf16, hence the loose tol)
    assert bool(jnp.all(jnp.abs(jnp.sum(jnp.exp(zs32), axis=-1) - 1.0) < 5e-2))
    print("KERNEL_OK")
</pallas_src>

<mosaic_0001>
module attributes {stable_mosaic.version = 11 : i64} {
  func.func @_mm_kernel(%arg0: i32, %arg1: memref<16x320xf32, #tpu.memory_space<vmem>>, %arg2: memref<320x384xbf16, #tpu.memory_space<vmem>>, %arg3: memref<1x384xf32, #tpu.memory_space<vmem>>, %arg4: memref<16x384xf32, #tpu.memory_space<vmem>>) attributes {dimension_semantics = [#tpu.dimension_semantics<parallel>], iteration_bounds = array<i64: 1>, scalar_prefetch = 0 : i64, scratch_operands = 0 : i64, tpu.core_type = #tpu.core_type<tc>, window_params = [{transform_indices = @transform_0, window_bounds = array<i64: 16, 320>}, {pipeline_mode = #tpu.pipeline_mode<synchronous>, transform_indices = @transform_1, window_bounds = array<i64: 320, 384>}, {pipeline_mode = #tpu.pipeline_mode<synchronous>, transform_indices = @transform_2, window_bounds = array<i64: 1, 384>}, {transform_indices = @transform_3, window_bounds = array<i64: 16, 384>}]} {
    %c0 = arith.constant 0 : index
    %c0_0 = arith.constant 0 : index
    %0 = vector.load %arg1[%c0, %c0_0] : memref<16x320xf32, #tpu.memory_space<vmem>>, vector<16x320xf32>
    %1 = arith.truncf %0 : vector<16x320xf32> to vector<16x320xbf16>
    %c0_1 = arith.constant 0 : index
    %c0_2 = arith.constant 0 : index
    %2 = vector.load %arg2[%c0_1, %c0_2] : memref<320x384xbf16, #tpu.memory_space<vmem>>, vector<320x384xbf16>
    %cst = arith.constant dense<0.000000e+00> : vector<16x384xf32>
    %3 = tpu.matmul %1, %2, %cst {dimension_numbers = #tpu.dot_dimension_numbers<[1], [0], [0], [1], [0, 0, 1, 1], [], []>} : vector<16x320xbf16>, vector<320x384xbf16>, vector<16x384xf32> -> vector<16x384xf32>
    %c0_3 = arith.constant 0 : index
    %c0_4 = arith.constant 0 : index
    %4 = vector.load %arg3[%c0_3, %c0_4] : memref<1x384xf32, #tpu.memory_space<vmem>>, vector<1x384xf32>
    %5 = vector.broadcast %4 : vector<1x384xf32> to vector<16x384xf32>
    %6 = arith.addf %3, %5 : vector<16x384xf32>
    %c0_5 = arith.constant 0 : index
    %c0_6 = arith.constant 0 : index
    %7 = vector.load %arg4[%c0_5, %c0_6] : memref<16x384xf32, #tpu.memory_space<vmem>>, vector<16x384xf32>
    tpu.vector_store %arg4[%c0_5, %c0_6], %6 {strides = array<i32>} : memref<16x384xf32, #tpu.memory_space<vmem>>, vector<16x384xf32>,
    return
  }
  func.func @transform_0(%arg0: i32) -> (i32, i32) {
    %c0_i32 = arith.constant 0 : i32
    %c0_i32_0 = arith.constant 0 : i32
    return %arg0, %c0_i32 : i32, i32
  }
  func.func @transform_1(%arg0: i32) -> (i32, i32) {
    %c0_i32 = arith.constant 0 : i32
    %c0_i32_0 = arith.constant 0 : i32
    %c0_i32_1 = arith.constant 0 : i32
    return %c0_i32, %c0_i32_0 : i32, i32
  }
  func.func @transform_2(%arg0: i32) -> (i32, i32) {
    %c0_i32 = arith.constant 0 : i32
    %c0_i32_0 = arith.constant 0 : i32
    %c0_i32_1 = arith.constant 0 : i32
    return %c0_i32, %c0_i32_0 : i32, i32
  }
  func.func @transform_3(%arg0: i32) -> (i32, i32) {
    %c0_i32 = arith.constant 0 : i32
    %c0_i32_0 = arith.constant 0 : i32
    return %arg0, %c0_i32 : i32, i32
  }
}

module attributes {stable_mosaic.version = 11 : i64} {
  func.func @_bigru_step_kernel(%arg0: i32, %arg1: memref<1x2x192xf32, #tpu.memory_space<vmem>>, %arg2: memref<1x2x192xf32, #tpu.memory_space<vmem>>, %arg3: memref<1x2x1xf32, #tpu.memory_space<vmem>>, %arg4: memref<1x2x1xf32, #tpu.memory_space<vmem>>, %arg5: memref<64x192xf32, #tpu.memory_space<vmem>>, %arg6: memref<64x192xf32, #tpu.memory_space<vmem>>, %arg7: memref<1x192xf32, #tpu.memory_space<vmem>>, %arg8: memref<1x192xf32, #tpu.memory_space<vmem>>, %arg9: memref<1x2x64xf32, #tpu.memory_space<vmem>>, %arg10: memref<1x2x64xf32, #tpu.memory_space<vmem>>, %arg11: memref<2x64xf32, #tpu.memory_space<vmem>>, %arg12: memref<2x64xf32, #tpu.memory_space<vmem>>) attributes {dimension_semantics = [#tpu.dimension_semantics<arbitrary>], iteration_bounds = array<i64: 8>, scalar_prefetch = 0 : i64, scratch_operands = 2 : i64, tpu.core_type = #tpu.core_type<tc>, window_params = [{transform_indices = @transform_0, window_bounds = array<i64: 1, 2, 192>}, {transform_indices = @transform_1, window_bounds = array<i64: 1, 2, 192>}, {transform_indices = @transform_2, window_bounds = array<i64: 1, 2, 1>}, {transform_indices = @transform_3, window_bounds = array<i64: 1, 2, 1>}, {pipeline_mode = #tpu.pipeline_mode<synchronous>, transform_indices = @transform_4, window_bounds = array<i64: 64, 192>}, {pipeline_mode = #tpu.pipeline_mode<synchronous>, transform_indices = @transform_5, window_bounds = array<i64: 64, 192>}, {pipeline_mode = #tpu.pipeline_mode<synchronous>, transform_indices = @transform_6, window_bounds = array<i64: 1, 192>}, {pipeline_mode = #tpu.pipeline_mode<synchronous>, transform_indices = @transform_7, window_bounds = array<i64: 1, 192>}, {transform_indices = @transform_8, window_bounds = array<i64: 1, 2, 64>}, {transform_indices = @transform_9, window_bounds = array<i64: 1, 2, 64>}]} {
    %c0_i32 = arith.constant 0 : i32
    %0 = arith.cmpi eq, %arg0, %c0_i32 : i32
    %1 = arith.extui %0 : i1 to i32
    %c0_i32_0 = arith.constant 0 : i32
    %2 = arith.cmpi ne, %1, %c0_i32_0 : i32
    scf.if %2 {
      %cst_43 = arith.constant 0.000000e+00 : f32
      %99 = vector.broadcast %cst_43 : f32 to vector<2x64xf32>
      %c0_44 = arith.constant 0 : index
      %c0_45 = arith.constant 0 : index
      %100 = vector.load %arg11[%c0_44, %c0_45] : memref<2x64xf32, #tpu.memory_space<vmem>>, vector<2x64xf32>
      tpu.vector_store %arg11[%c0_44, %c0_45], %99 {strides = array<i32>} : memref<2x64xf32, #tpu.memory_space<vmem>>, vector<2x64xf32>,
      %cst_46 = arith.constant 0.000000e+00 : f32
      %101 = vector.broadcast %cst_46 : f32 to vector<2x64xf32>
      %c0_47 = arith.constant 0 : index
      %c0_48 = arith.constant 0 : index
      %102 = vector.load %arg12[%c0_47, %c0_48] : memref<2x64xf32, #tpu.memory_space<vmem>>, vector<2x64xf32>
      tpu.vector_store %arg12[%c0_47, %c0_48], %101 {strides = array<i32>} : memref<2x64xf32, #tpu.memory_space<vmem>>, vector<2x64xf32>,
    } else {
    }
    %c0 = arith.constant 0 : index
    %c0_1 = arith.constant 0 : index
    %3 = vector.load %arg11[%c0, %c0_1] : memref<2x64xf32, #tpu.memory_space<vmem>>, vector<2x64xf32>
    %c0_2 = arith.constant 0 : index
    %c0_3 = arith.constant 0 : index
    %c0_4 = arith.constant 0 : index
    %4 = vector.load %arg1[%c0_2, %c0_3, %c0_4] : memref<1x2x192xf32, #tpu.memory_space<vmem>>, vector<1x2x192xf32>
    %5 = vector.shape_cast %4 : vector<1x2x192xf32> to vector<2x192xf32>
    %c0_5 = arith.constant 0 : index
    %c0_6 = arith.constant 0 : index
    %6 = vector.load %arg5[%c0_5, %c0_6] : memref<64x192xf32, #tpu.memory_space<vmem>>, vector<64x192xf32>
    %cst = arith.constant dense<0.000000e+00> : vector<2x192xf32>
    %7 = tpu.matmul %3, %6, %cst {dimension_numbers = #tpu.dot_dimension_numbers<[1], [0], [0], [1], [0, 0, 1, 1], [], []>} : vector<2x64xf32>, vector<64x192xf32>, vector<2x192xf32> -> vector<2x192xf32>
    %c0_7 = arith.constant 0 : index
    %c0_8 = arith.constant 0 : index
    %8 = vector.load %arg7[%c0_7, %c0_8] : memref<1x192xf32, #tpu.memory_space<vmem>>, vector<1x192xf32>
    %9 = vector.broadcast %8 : vector<1x192xf32> to vector<2x192xf32>
    %10 = arith.addf %7, %9 : vector<2x192xf32>
    %11 = vector.extract_strided_slice %5 {offsets = [0, 0], sizes = [2, 64], strides = [1, 1]} : vector<2x192xf32> to vector<2x64xf32>
    %12 = vector.extract_strided_slice %10 {offsets = [0, 0], sizes = [2, 64], strides = [1, 1]} : vector<2x192xf32> to vector<2x64xf32>
    %13 = arith.addf %11, %12 : vector<2x64xf32>
    %14 = arith.negf %13 : vector<2x64xf32>
    %15 = math.exp %14 : vector<2x64xf32>
    %cst_9 = arith.constant 1.000000e+00 : f32
    %16 = vector.broadcast %cst_9 : f32 to vector<2x64xf32>
    %17 = arith.addf %16, %15 : vector<2x64xf32>
    %18 = arith.divf %16, %17 : vector<2x64xf32>
    %19 = vector.extract_strided_slice %5 {offsets = [0, 64], sizes = [2, 64], strides = [1, 1]} : vector<2x192xf32> to vector<2x64xf32>
    %20 = vector.extract_strided_slice %10 {offsets = [0, 64], sizes = [2, 64], strides = [1, 1]} : vector<2x192xf32> to vector<2x64xf32>
    %21 = arith.addf %19, %20 : vector<2x64xf32>
    %22 = arith.negf %21 : vector<2x64xf32>
    %23 = math.exp %22 : vector<2x64xf32>
    %cst_10 = arith.constant 1.000000e+00 : f32
    %24 = vector.broadcast %cst_10 : f32 to vector<2x64xf32>
    %25 = arith.addf %24, %23 : vector<2x64xf32>
    %26 = arith.divf %24, %25 : vector<2x64xf32>
    %27 = vector.extract_strided_slice %5 {offsets = [0, 128], sizes = [2, 64], strides = [1, 1]} : vector<2x192xf32> to vector<2x64xf32>
    %28 = vector.extract_strided_slice %10 {offsets = [0, 128], sizes = [2, 64], strides = [1, 1]} : vector<2x192xf32> to vector<2x64xf32>
    %29 = arith.mulf %18, %28 : vector<2x64xf32>
    %30 = arith.addf %27, %29 : vector<2x64xf32>
    %31 = math.tanh %30 : vector<2x64xf32>
    %cst_11 = arith.constant 1.000000e+00 : f32
    %32 = vector.broadcast %cst_11 : f32 to vector<2x64xf32>
    %33 = arith.subf %32, %26 : vector<2x64xf32>
    %34 = arith.mulf %33, %31 : vector<2x64xf32>
    %35 = arith.mulf %26, %3 : vector<2x64xf32>
    %36 = arith.addf %34, %35 : vector<2x64xf32>
    %c0_12 = arith.constant 0 : index
    %c0_13 = arith.constant 0 : index
    %c0_14 = arith.constant 0 : index
    %37 = vector.load %arg3[%c0_12, %c0_13, %c0_14] : memref<1x2x1xf32, #tpu.memory_space<vmem>>, vector<1x2x1xf32>
    %38 = vector.shape_cast %37 : vector<1x2x1xf32> to vector<2x1xf32>
    %39 = vector.broadcast %38 : vector<2x1xf32> to vector<2x64xf32>
    %40 = arith.mulf %39, %36 : vector<2x64xf32>
    %cst_15 = arith.constant 1.000000e+00 : f32
    %41 = vector.broadcast %cst_15 : f32 to vector<2x1xf32>
    %42 = arith.subf %41, %38 : vector<2x1xf32>
    %43 = vector.broadcast %42 : vector<2x1xf32> to vector<2x64xf32>
    %44 = arith.mulf %43, %3 : vector<2x64xf32>
    %45 = arith.addf %40, %44 : vector<2x64xf32>
    %c0_16 = arith.constant 0 : index
    %c0_17 = arith.constant 0 : index
    %46 = vector.load %arg11[%c0_16, %c0_17] : memref<2x64xf32, #tpu.memory_space<vmem>>, vector<2x64xf32>
    tpu.vector_store %arg11[%c0_16, %c0_17], %45 {strides = array<i32>} : memref<2x64xf32, #tpu.memory_space<vmem>>, vector<2x64xf32>,
    %47 = vector.broadcast %38 : vector<2x1xf32> to vector<2x64xf32>
    %48 = arith.mulf %47, %36 : vector<2x64xf32>
    %49 = vector.shape_cast %48 : vector<2x64xf32> to vector<1x2x64xf32>
    %c0_18 = arith.constant 0 : index
    %c0_19 = arith.constant 0 : index
    %c0_20 = arith.constant 0 : index
    %50 = vector.load %arg9[%c0_18, %c0_19, %c0_20] : memref<1x2x64xf32, #tpu.memory_space<vmem>>, vector<1x2x64xf32>
    tpu.vector_store %arg9[%c0_18, %c0_19, %c0_20], %49 {strides = array<i32>} : memref<1x2x64xf32, #tpu.memory_space<vmem>>, vector<1x2x64xf32>,
    %c0_21 = arith.constant 0 : index
    %c0_22 = arith.constant 0 : index
    %51 = vector.load %arg12[%c0_21, %c0_22] : memref<2x64xf32, #tpu.memory_space<vmem>>, vector<2x64xf32>
    %c0_23 = arith.constant 0 : index
    %c0_24 = arith.constant 0 : index
    %c0_25 = arith.constant 0 : index
    %52 = vector.load %arg2[%c0_23, %c0_24, %c0_25] : memref<1x2x192xf32, #tpu.memory_space<vmem>>, vector<1x2x192xf32>
    %53 = vector.shape_cast %52 : vector<1x2x192xf32> to vector<2x192xf32>
    %c0_26 = arith.constant 0 : index
    %c0_27 = arith.constant 0 : index
    %54 = vector.load %arg6[%c0_26, %c0_27] : memref<64x192xf32, #tpu.memory_space<vmem>>, vector<64x192xf32>
    %cst_28 = arith.constant dense<0.000000e+00> : vector<2x192xf32>
    %55 = tpu.matmul %51, %54, %cst_28 {dimension_numbers = #tpu.dot_dimension_numbers<[1], [0], [0], [1], [0, 0, 1, 1], [], []>} : vector<2x64xf32>, vector<64x192xf32>, vector<2x192xf32> -> vector<2x192xf32>
    %c0_29 = arith.constant 0 : index
    %c0_30 = arith.constant 0 : index
    %56 = vector.load %arg8[%c0_29, %c0_30] : memref<1x192xf32, #tpu.memory_space<vmem>>, vector<1x192xf32>
    %57 = vector.broadcast %56 : vector<1x192xf32> to vector<2x192xf32>
    %58 = arith.addf %55, %57 : vector<2x192xf32>
    %59 = vector.extract_strided_slice %53 {offsets = [0, 0], sizes = [2, 64], strides = [1, 1]} : vector<2x192xf32> to vector<2x64xf32>
    %60 = vector.extract_strided_slice %58 {offsets = [0, 0], sizes = [2, 64], strides = [1, 1]} : vector<2x192xf32> to vector<2x64xf32>
    %61 = arith.addf %59, %60 : vector<2x64xf32>
    %62 = arith.negf %61 : vector<2x64xf32>
    %63 = math.exp %62 : vector<2x64xf32>
    %cst_31 = arith.constant 1.000000e+00 : f32
    %64 = vector.broadcast %cst_31 : f32 to vector<2x64xf32>
    %65 = arith.addf %64, %63 : vector<2x64xf32>
    %66 = arith.divf %64, %65 : vector<2x64xf32>
    %67 = vector.extract_strided_slice %53 {offsets = [0, 64], sizes = [2, 64], strides = [1, 1]} : vector<2x192xf32> to vector<2x64xf32>
    %68 = vector.extract_strided_slice %58 {offsets = [0, 64], sizes = [2, 64], strides = [1, 1]} : vector<2x192xf32> to vector<2x64xf32>
    %69 = arith.addf %67, %68 : vector<2x64xf32>
    %70 = arith.negf %69 : vector<2x64xf32>
    %71 = math.exp %70 : vector<2x64xf32>
    %cst_32 = arith.constant 1.000000e+00 : f32
    %72 = vector.broadcast %cst_32 : f32 to vector<2x64xf32>
    %73 = arith.addf %72, %71 : vector<2x64xf32>
    %74 = arith.divf %72, %73 : vector<2x64xf32>
    %75 = vector.extract_strided_slice %53 {offsets = [0, 128], sizes = [2, 64], strides = [1, 1]} : vector<2x192xf32> to vector<2x64xf32>
    %76 = vector.extract_strided_slice %58 {offsets = [0, 128], sizes = [2, 64], strides = [1, 1]} : vector<2x192xf32> to vector<2x64xf32>
    %77 = arith.mulf %66, %76 : vector<2x64xf32>
    %78 = arith.addf %75, %77 : vector<2x64xf32>
    %79 = math.tanh %78 : vector<2x64xf32>
    %cst_33 = arith.constant 1.000000e+00 : f32
    %80 = vector.broadcast %cst_33 : f32 to vector<2x64xf32>
    %81 = arith.subf %80, %74 : vector<2x64xf32>
    %82 = arith.mulf %81, %79 : vector<2x64xf32>
    %83 = arith.mulf %74, %51 : vector<2x64xf32>
    %84 = arith.addf %82, %83 : vector<2x64xf32>
    %c0_34 = arith.constant 0 : index
    %c0_35 = arith.constant 0 : index
    %c0_36 = arith.constant 0 : index
    %85 = vector.load %arg4[%c0_34, %c0_35, %c0_36] : memref<1x2x1xf32, #tpu.memory_space<vmem>>, vector<1x2x1xf32>
    %86 = vector.shape_cast %85 : vector<1x2x1xf32> to vector<2x1xf32>
    %87 = vector.broadcast %86 : vector<2x1xf32> to vector<2x64xf32>
    %88 = arith.mulf %87, %84 : vector<2x64xf32>
    %cst_37 = arith.constant 1.000000e+00 : f32
    %89 = vector.broadcast %cst_37 : f32 to vector<2x1xf32>
    %90 = arith.subf %89, %86 : vector<2x1xf32>
    %91 = vector.broadcast %90 : vector<2x1xf32> to vector<2x64xf32>
    %92 = arith.mulf %91, %51 : vector<2x64xf32>
    %93 = arith.addf %88, %92 : vector<2x64xf32>
    %c0_38 = arith.constant 0 : index
    %c0_39 = arith.constant 0 : index
    %94 = vector.load %arg12[%c0_38, %c0_39] : memref<2x64xf32, #tpu.memory_space<vmem>>, vector<2x64xf32>
    tpu.vector_store %arg12[%c0_38, %c0_39], %93 {strides = array<i32>} : memref<2x64xf32, #tpu.memory_space<vmem>>, vector<2x64xf32>,
    %95 = vector.broadcast %86 : vector<2x1xf32> to vector<2x64xf32>
    %96 = arith.mulf %95, %84 : vector<2x64xf32>
    %97 = vector.shape_cast %96 : vector<2x64xf32> to vector<1x2x64xf32>
    %c0_40 = arith.constant 0 : index
    %c0_41 = arith.constant 0 : index
    %c0_42 = arith.constant 0 : index
    %98 = vector.load %arg10[%c0_40, %c0_41, %c0_42] : memref<1x2x64xf32, #tpu.memory_space<vmem>>, vector<1x2x64xf32>
    tpu.vector_store %arg10[%c0_40, %c0_41, %c0_42], %97 {strides = array<i32>} : memref<1x2x64xf32, #tpu.memory_space<vmem>>, vector<1x2x64xf32>,
    return
  }
  func.func @transform_0(%arg0: i32) -> (i32, i32, i32) {
    %c0_i32 = arith.constant 0 : i32
    %c0_i32_0 = arith.constant 0 : i32
    %c0_i32_1 = arith.constant 0 : i32
    return %arg0, %c0_i32, %c0_i32_0 : i32, i32, i32
  }
  func.func @transform_1(%arg0: i32) -> (i32, i32, i32) {
    %c7_i32 = arith.constant 7 : i32
    %0 = arith.subi %c7_i32, %arg0 : i32
    %c0_i32 = arith.constant 0 : i32
    %c0_i32_0 = arith.constant 0 : i32
    %c0_i32_1 = arith.constant 0 : i32
    return %0, %c0_i32, %c0_i32_0 : i32, i32, i32
  }
  func.func @transform_2(%arg0: i32) -> (i32, i32, i32) {
    %c0_i32 = arith.constant 0 : i32
    %c0_i32_0 = arith.constant 0 : i32
    %c0_i32_1 = arith.constant 0 : i32
    return %arg0, %c0_i32, %c0_i32_0 : i32, i32, i32
  }
  func.func @transform_3(%arg0: i32) -> (i32, i32, i32) {
    %c7_i32 = arith.constant 7 : i32
    %0 = arith.subi %c7_i32, %arg0 : i32
    %c0_i32 = arith.constant 0 : i32
    %c0_i32_0 = arith.constant 0 : i32
    %c0_i32_1 = arith.constant 0 : i32
    return %0, %c0_i32, %c0_i32_0 : i32, i32, i32
  }
  func.func @transform_4(%arg0: i32) -> (i32, i32) {
    %c0_i32 = arith.constant 0 : i32
    %c0_i32_0 = arith.constant 0 : i32
    %c0_i32_1 = arith.constant 0 : i32
    return %c0_i32, %c0_i32_0 : i32, i32
  }
  func.func @transform_5(%arg0: i32) -> (i32, i32) {
    %c0_i32 = arith.constant 0 : i32
    %c0_i32_0 = arith.constant 0 : i32
    %c0_i32_1 = arith.constant 0 : i32
    return %c0_i32, %c0_i32_0 : i32, i32
  }
  func.func @transform_6(%arg0: i32) -> (i32, i32) {
    %c0_i32 = arith.constant 0 : i32
    %c0_i32_0 = arith.constant 0 : i32
    %c0_i32_1 = arith.constant 0 : i32
    return %c0_i32, %c0_i32_0 : i32, i32
  }
  func.func @transform_7(%arg0: i32) -> (i32, i32) {
    %c0_i32 = arith.constant 0 : i32
    %c0_i32_0 = arith.constant 0 : i32
    %c0_i32_1 = arith.constant 0 : i32
    return %c0_i32, %c0_i32_0 : i32, i32
  }
  func.func @transform_8(%arg0: i32) -> (i32, i32, i32) {
    %c0_i32 = arith.constant 0 : i32
    %c0_i32_0 = arith.constant 0 : i32
    %c0_i32_1 = arith.constant 0 : i32
    return %arg0, %c0_i32, %c0_i32_0 : i32, i32, i32
  }
  func.func @transform_9(%arg0: i32) -> (i32, i32, i32) {
    %c7_i32 = arith.constant 7 : i32
    %0 = arith.subi %c7_i32, %arg0 : i32
    %c0_i32 = arith.constant 0 : i32
    %c0_i32_0 = arith.constant 0 : i32
    %c0_i32_1 = arith.constant 0 : i32
    return %0, %c0_i32, %c0_i32_0 : i32, i32, i32
  }
}

module attributes {stable_mosaic.version = 11 : i64} {
  func.func @_mm_kernel(%arg0: i32, %arg1: memref<16x128xf32, #tpu.memory_space<vmem>>, %arg2: memref<128x384xbf16, #tpu.memory_space<vmem>>, %arg3: memref<1x384xf32, #tpu.memory_space<vmem>>, %arg4: memref<16x384xf32, #tpu.memory_space<vmem>>) attributes {dimension_semantics = [#tpu.dimension_semantics<parallel>], iteration_bounds = array<i64: 1>, scalar_prefetch = 0 : i64, scratch_operands = 0 : i64, tpu.core_type = #tpu.core_type<tc>, window_params = [{transform_indices = @transform_0, window_bounds = array<i64: 16, 128>}, {pipeline_mode = #tpu.pipeline_mode<synchronous>, transform_indices = @transform_1, window_bounds = array<i64: 128, 384>}, {pipeline_mode = #tpu.pipeline_mode<synchronous>, transform_indices = @transform_2, window_bounds = array<i64: 1, 384>}, {transform_indices = @transform_3, window_bounds = array<i64: 16, 384>}]} {
    %c0 = arith.constant 0 : index
    %c0_0 = arith.constant 0 : index
    %0 = vector.load %arg1[%c0, %c0_0] : memref<16x128xf32, #tpu.memory_space<vmem>>, vector<16x128xf32>
    %1 = arith.truncf %0 : vector<16x128xf32> to vector<16x128xbf16>
    %c0_1 = arith.constant 0 : index
    %c0_2 = arith.constant 0 : index
    %2 = vector.load %arg2[%c0_1, %c0_2] : memref<128x384xbf16, #tpu.memory_space<vmem>>, vector<128x384xbf16>
    %cst = arith.constant dense<0.000000e+00> : vector<16x384xf32>
    %3 = tpu.matmul %1, %2, %cst {dimension_numbers = #tpu.dot_dimension_numbers<[1], [0], [0], [1], [0, 0, 1, 1], [], []>} : vector<16x128xbf16>, vector<128x384xbf16>, vector<16x384xf32> -> vector<16x384xf32>
    %c0_3 = arith.constant 0 : index
    %c0_4 = arith.constant 0 : index
    %4 = vector.load %arg3[%c0_3, %c0_4] : memref<1x384xf32, #tpu.memory_space<vmem>>, vector<1x384xf32>
    %5 = vector.broadcast %4 : vector<1x384xf32> to vector<16x384xf32>
    %6 = arith.addf %3, %5 : vector<16x384xf32>
    %c0_5 = arith.constant 0 : index
    %c0_6 = arith.constant 0 : index
    %7 = vector.load %arg4[%c0_5, %c0_6] : memref<16x384xf32, #tpu.memory_space<vmem>>, vector<16x384xf32>
    tpu.vector_store %arg4[%c0_5, %c0_6], %6 {strides = array<i32>} : memref<16x384xf32, #tpu.memory_space<vmem>>, vector<16x384xf32>,
    return
  }
  func.func @transform_0(%arg0: i32) -> (i32, i32) {
    %c0_i32 = arith.constant 0 : i32
    %c0_i32_0 = arith.constant 0 : i32
    return %arg0, %c0_i32 : i32, i32
  }
  func.func @transform_1(%arg0: i32) -> (i32, i32) {
    %c0_i32 = arith.constant 0 : i32
    %c0_i32_0 = arith.constant 0 : i32
    %c0_i32_1 = arith.constant 0 : i32
    return %c0_i32, %c0_i32_0 : i32, i32
  }
  func.func @transform_2(%arg0: i32) -> (i32, i32) {
    %c0_i32 = arith.constant 0 : i32
    %c0_i32_0 = arith.constant 0 : i32
    %c0_i32_1 = arith.constant 0 : i32
    return %c0_i32, %c0_i32_0 : i32, i32
  }
  func.func @transform_3(%arg0: i32) -> (i32, i32) {
    %c0_i32 = arith.constant 0 : i32
    %c0_i32_0 = arith.constant 0 : i32
    return %arg0, %c0_i32 : i32, i32
  }
}

module attributes {stable_mosaic.version = 11 : i64} {
  func.func @_mm_kernel(%arg0: i32, %arg1: memref<16x64xf32, #tpu.memory_space<vmem>>, %arg2: memref<64x128xbf16, #tpu.memory_space<vmem>>, %arg3: memref<1x128xf32, #tpu.memory_space<vmem>>, %arg4: memref<16x128xbf16, #tpu.memory_space<vmem>>) attributes {dimension_semantics = [#tpu.dimension_semantics<parallel>], iteration_bounds = array<i64: 1>, scalar_prefetch = 0 : i64, scratch_operands = 0 : i64, tpu.core_type = #tpu.core_type<tc>, window_params = [{transform_indices = @transform_0, window_bounds = array<i64: 16, 64>}, {pipeline_mode = #tpu.pipeline_mode<synchronous>, transform_indices = @transform_1, window_bounds = array<i64: 64, 128>}, {pipeline_mode = #tpu.pipeline_mode<synchronous>, transform_indices = @transform_2, window_bounds = array<i64: 1, 128>}, {transform_indices = @transform_3, window_bounds = array<i64: 16, 128>}]} {
    %c0 = arith.constant 0 : index
    %c0_0 = arith.constant 0 : index
    %0 = vector.load %arg1[%c0, %c0_0] : memref<16x64xf32, #tpu.memory_space<vmem>>, vector<16x64xf32>
    %1 = arith.truncf %0 : vector<16x64xf32> to vector<16x64xbf16>
    %c0_1 = arith.constant 0 : index
    %c0_2 = arith.constant 0 : index
    %2 = vector.load %arg2[%c0_1, %c0_2] : memref<64x128xbf16, #tpu.memory_space<vmem>>, vector<64x128xbf16>
    %cst = arith.constant dense<0.000000e+00> : vector<16x128xf32>
    %3 = tpu.matmul %1, %2, %cst {dimension_numbers = #tpu.dot_dimension_numbers<[1], [0], [0], [1], [0, 0, 1, 1], [], []>} : vector<16x64xbf16>, vector<64x128xbf16>, vector<16x128xf32> -> vector<16x128xf32>
    %c0_3 = arith.constant 0 : index
    %c0_4 = arith.constant 0 : index
    %4 = vector.load %arg3[%c0_3, %c0_4] : memref<1x128xf32, #tpu.memory_space<vmem>>, vector<1x128xf32>
    %5 = vector.broadcast %4 : vector<1x128xf32> to vector<16x128xf32>
    %6 = arith.addf %3, %5 : vector<16x128xf32>
    %7 = arith.truncf %6 : vector<16x128xf32> to vector<16x128xbf16>
    %c0_5 = arith.constant 0 : index
    %c0_6 = arith.constant 0 : index
    %8 = vector.load %arg4[%c0_5, %c0_6] : memref<16x128xbf16, #tpu.memory_space<vmem>>, vector<16x128xbf16>
    tpu.vector_store %arg4[%c0_5, %c0_6], %7 {strides = array<i32>} : memref<16x128xbf16, #tpu.memory_space<vmem>>, vector<16x128xbf16>,
    return
  }
  func.func @transform_0(%arg0: i32) -> (i32, i32) {
    %c0_i32 = arith.constant 0 : i32
    %c0_i32_0 = arith.constant 0 : i32
    return %arg0, %c0_i32 : i32, i32
  }
  func.func @transform_1(%arg0: i32) -> (i32, i32) {
    %c0_i32 = arith.constant 0 : i32
    %c0_i32_0 = arith.constant 0 : i32
    %c0_i32_1 = arith.constant 0 : i32
    return %c0_i32, %c0_i32_0 : i32, i32
  }
  func.func @transform_2(%arg0: i32) -> (i32, i32) {
    %c0_i32 = arith.constant 0 : i32
    %c0_i32_0 = arith.constant 0 : i32
    %c0_i32_1 = arith.constant 0 : i32
    return %c0_i32, %c0_i32_0 : i32, i32
  }
  func.func @transform_3(%arg0: i32) -> (i32, i32) {
    %c0_i32 = arith.constant 0 : i32
    %c0_i32_0 = arith.constant 0 : i32
    return %arg0, %c0_i32 : i32, i32
  }
}

module attributes {stable_mosaic.version = 11 : i64} {
  func.func @_mm_kernel(%arg0: i32, %arg1: memref<14x32xf32, #tpu.memory_space<vmem>>, %arg2: memref<32x256xbf16, #tpu.memory_space<vmem>>, %arg3: memref<1x256xf32, #tpu.memory_space<vmem>>, %arg4: memref<14x256xf32, #tpu.memory_space<vmem>>) attributes {dimension_semantics = [#tpu.dimension_semantics<parallel>], iteration_bounds = array<i64: 1>, scalar_prefetch = 0 : i64, scratch_operands = 0 : i64, tpu.core_type = #tpu.core_type<tc>, window_params = [{transform_indices = @transform_0, window_bounds = array<i64: 14, 32>}, {pipeline_mode = #tpu.pipeline_mode<synchronous>, transform_indices = @transform_1, window_bounds = array<i64: 32, 256>}, {pipeline_mode = #tpu.pipeline_mode<synchronous>, transform_indices = @transform_2, window_bounds = array<i64: 1, 256>}, {transform_indices = @transform_3, window_bounds = array<i64: 14, 256>}]} {
    %c0 = arith.constant 0 : index
    %c0_0 = arith.constant 0 : index
    %0 = vector.load %arg1[%c0, %c0_0] : memref<14x32xf32, #tpu.memory_space<vmem>>, vector<14x32xf32>
    %1 = arith.truncf %0 : vector<14x32xf32> to vector<14x32xbf16>
    %c0_1 = arith.constant 0 : index
    %c0_2 = arith.constant 0 : index
    %2 = vector.load %arg2[%c0_1, %c0_2] : memref<32x256xbf16, #tpu.memory_space<vmem>>, vector<32x256xbf16>
    %cst = arith.constant dense<0.000000e+00> : vector<14x256xf32>
    %3 = tpu.matmul %1, %2, %cst {dimension_numbers = #tpu.dot_dimension_numbers<[1], [0], [0], [1], [0, 0, 1, 1], [], []>} : vector<14x32xbf16>, vector<32x256xbf16>, vector<14x256xf32> -> vector<14x256xf32>
    %c0_3 = arith.constant 0 : index
    %c0_4 = arith.constant 0 : index
    %4 = vector.load %arg3[%c0_3, %c0_4] : memref<1x256xf32, #tpu.memory_space<vmem>>, vector<1x256xf32>
    %5 = vector.broadcast %4 : vector<1x256xf32> to vector<14x256xf32>
    %6 = arith.addf %3, %5 : vector<14x256xf32>
    %c0_5 = arith.constant 0 : index
    %c0_6 = arith.constant 0 : index
    %7 = vector.load %arg4[%c0_5, %c0_6] : memref<14x256xf32, #tpu.memory_space<vmem>>, vector<14x256xf32>
    tpu.vector_store %arg4[%c0_5, %c0_6], %6 {strides = array<i32>} : memref<14x256xf32, #tpu.memory_space<vmem>>, vector<14x256xf32>,
    return
  }
  func.func @transform_0(%arg0: i32) -> (i32, i32) {
    %c0_i32 = arith.constant 0 : i32
    %c0_i32_0 = arith.constant 0 : i32
    return %arg0, %c0_i32 : i32, i32
  }
  func.func @transform_1(%arg0: i32) -> (i32, i32) {
    %c0_i32 = arith.constant 0 : i32
    %c0_i32_0 = arith.constant 0 : i32
    %c0_i32_1 = arith.constant 0 : i32
    return %c0_i32, %c0_i32_0 : i32, i32
  }
  func.func @transform_2(%arg0: i32) -> (i32, i32) {
    %c0_i32 = arith.constant 0 : i32
    %c0_i32_0 = arith.constant 0 : i32
    %c0_i32_1 = arith.constant 0 : i32
    return %c0_i32, %c0_i32_0 : i32, i32
  }
  func.func @transform_3(%arg0: i32) -> (i32, i32) {
    %c0_i32 = arith.constant 0 : i32
    %c0_i32_0 = arith.constant 0 : i32
    return %arg0, %c0_i32 : i32, i32
  }
}

module attributes {stable_mosaic.version = 11 : i64} {
  func.func @_lstm_step_kernel(%arg0: i32, %arg1: memref<1x2x256xf32, #tpu.memory_space<vmem>>, %arg2: memref<1x2x1xf32, #tpu.memory_space<vmem>>, %arg3: memref<64x256xf32, #tpu.memory_space<vmem>>, %arg4: memref<1x256xf32, #tpu.memory_space<vmem>>, %arg5: memref<1x2x64xf32, #tpu.memory_space<vmem>>, %arg6: memref<2x64xf32, #tpu.memory_space<vmem>>, %arg7: memref<2x64xf32, #tpu.memory_space<vmem>>) attributes {dimension_semantics = [#tpu.dimension_semantics<arbitrary>], iteration_bounds = array<i64: 7>, scalar_prefetch = 0 : i64, scratch_operands = 2 : i64, tpu.core_type = #tpu.core_type<tc>, window_params = [{transform_indices = @transform_0, window_bounds = array<i64: 1, 2, 256>}, {transform_indices = @transform_1, window_bounds = array<i64: 1, 2, 1>}, {pipeline_mode = #tpu.pipeline_mode<synchronous>, transform_indices = @transform_2, window_bounds = array<i64: 64, 256>}, {pipeline_mode = #tpu.pipeline_mode<synchronous>, transform_indices = @transform_3, window_bounds = array<i64: 1, 256>}, {transform_indices = @transform_4, window_bounds = array<i64: 1, 2, 64>}]} {
    %c0_i32 = arith.constant 0 : i32
    %0 = arith.cmpi eq, %arg0, %c0_i32 : i32
    %1 = arith.extui %0 : i1 to i32
    %c0_i32_0 = arith.constant 0 : i32
    %2 = arith.cmpi ne, %1, %c0_i32_0 : i32
    scf.if %2 {
      %cst_26 = arith.constant 0.000000e+00 : f32
      %60 = vector.broadcast %cst_26 : f32 to vector<2x64xf32>
      %c0_27 = arith.constant 0 : index
      %c0_28 = arith.constant 0 : index
      %61 = vector.load %arg6[%c0_27, %c0_28] : memref<2x64xf32, #tpu.memory_space<vmem>>, vector<2x64xf32>
      tpu.vector_store %arg6[%c0_27, %c0_28], %60 {strides = array<i32>} : memref<2x64xf32, #tpu.memory_space<vmem>>, vector<2x64xf32>,
      %cst_29 = arith.constant 0.000000e+00 : f32
      %62 = vector.broadcast %cst_29 : f32 to vector<2x64xf32>
      %c0_30 = arith.constant 0 : index
      %c0_31 = arith.constant 0 : index
      %63 = vector.load %arg7[%c0_30, %c0_31] : memref<2x64xf32, #tpu.memory_space<vmem>>, vector<2x64xf32>
      tpu.vector_store %arg7[%c0_30, %c0_31], %62 {strides = array<i32>} : memref<2x64xf32, #tpu.memory_space<vmem>>, vector<2x64xf32>,
    } else {
    }
    %c0 = arith.constant 0 : index
    %c0_1 = arith.constant 0 : index
    %3 = vector.load %arg6[%c0, %c0_1] : memref<2x64xf32, #tpu.memory_space<vmem>>, vector<2x64xf32>
    %c0_2 = arith.constant 0 : index
    %c0_3 = arith.constant 0 : index
    %4 = vector.load %arg7[%c0_2, %c0_3] : memref<2x64xf32, #tpu.memory_space<vmem>>, vector<2x64xf32>
    %c0_4 = arith.constant 0 : index
    %c0_5 = arith.constant 0 : index
    %c0_6 = arith.constant 0 : index
    %5 = vector.load %arg1[%c0_4, %c0_5, %c0_6] : memref<1x2x256xf32, #tpu.memory_space<vmem>>, vector<1x2x256xf32>
    %6 = vector.shape_cast %5 : vector<1x2x256xf32> to vector<2x256xf32>
    %c0_7 = arith.constant 0 : index
    %c0_8 = arith.constant 0 : index
    %7 = vector.load %arg3[%c0_7, %c0_8] : memref<64x256xf32, #tpu.memory_space<vmem>>, vector<64x256xf32>
    %cst = arith.constant dense<0.000000e+00> : vector<2x256xf32>
    %8 = tpu.matmul %3, %7, %cst {dimension_numbers = #tpu.dot_dimension_numbers<[1], [0], [0], [1], [0, 0, 1, 1], [], []>} : vector<2x64xf32>, vector<64x256xf32>, vector<2x256xf32> -> vector<2x256xf32>
    %9 = arith.addf %6, %8 : vector<2x256xf32>
    %c0_9 = arith.constant 0 : index
    %c0_10 = arith.constant 0 : index
    %10 = vector.load %arg4[%c0_9, %c0_10] : memref<1x256xf32, #tpu.memory_space<vmem>>, vector<1x256xf32>
    %11 = vector.broadcast %10 : vector<1x256xf32> to vector<2x256xf32>
    %12 = arith.addf %9, %11 : vector<2x256xf32>
    %13 = vector.extract_strided_slice %12 {offsets = [0, 0], sizes = [2, 64], strides = [1, 1]} : vector<2x256xf32> to vector<2x64xf32>
    %14 = arith.negf %13 : vector<2x64xf32>
    %15 = math.exp %14 : vector<2x64xf32>
    %cst_11 = arith.constant 1.000000e+00 : f32
    %16 = vector.broadcast %cst_11 : f32 to vector<2x64xf32>
    %17 = arith.addf %16, %15 : vector<2x64xf32>
    %18 = arith.divf %16, %17 : vector<2x64xf32>
    %19 = vector.extract_strided_slice %12 {offsets = [0, 64], sizes = [2, 64], strides = [1, 1]} : vector<2x256xf32> to vector<2x64xf32>
    %20 = arith.negf %19 : vector<2x64xf32>
    %21 = math.exp %20 : vector<2x64xf32>
    %cst_12 = arith.constant 1.000000e+00 : f32
    %22 = vector.broadcast %cst_12 : f32 to vector<2x64xf32>
    %23 = arith.addf %22, %21 : vector<2x64xf32>
    %24 = arith.divf %22, %23 : vector<2x64xf32>
    %25 = vector.extract_strided_slice %12 {offsets = [0, 128], sizes = [2, 64], strides = [1, 1]} : vector<2x256xf32> to vector<2x64xf32>
    %26 = math.tanh %25 : vector<2x64xf32>
    %27 = vector.extract_strided_slice %12 {offsets = [0, 192], sizes = [2, 64], strides = [1, 1]} : vector<2x256xf32> to vector<2x64xf32>
    %28 = arith.negf %27 : vector<2x64xf32>
    %29 = math.exp %28 : vector<2x64xf32>
    %cst_13 = arith.constant 1.000000e+00 : f32
    %30 = vector.broadcast %cst_13 : f32 to vector<2x64xf32>
    %31 = arith.addf %30, %29 : vector<2x64xf32>
    %32 = arith.divf %30, %31 : vector<2x64xf32>
    %33 = arith.mulf %24, %4 : vector<2x64xf32>
    %34 = arith.mulf %18, %26 : vector<2x64xf32>
    %35 = arith.addf %33, %34 : vector<2x64xf32>
    %36 = math.tanh %35 : vector<2x64xf32>
    %37 = arith.mulf %32, %36 : vector<2x64xf32>
    %c0_14 = arith.constant 0 : index
    %c0_15 = arith.constant 0 : index
    %c0_16 = arith.constant 0 : index
    %38 = vector.load %arg2[%c0_14, %c0_15, %c0_16] : memref<1x2x1xf32, #tpu.memory_space<vmem>>, vector<1x2x1xf32>
    %39 = vector.shape_cast %38 : vector<1x2x1xf32> to vector<2x1xf32>
    %40 = vector.broadcast %39 : vector<2x1xf32> to vector<2x64xf32>
    %41 = arith.mulf %40, %37 : vector<2x64xf32>
    %cst_17 = arith.constant 1.000000e+00 : f32
    %42 = vector.broadcast %cst_17 : f32 to vector<2x1xf32>
    %43 = arith.subf %42, %39 : vector<2x1xf32>
    %44 = vector.broadcast %43 : vector<2x1xf32> to vector<2x64xf32>
    %45 = arith.mulf %44, %3 : vector<2x64xf32>
    %46 = arith.addf %41, %45 : vector<2x64xf32>
    %c0_18 = arith.constant 0 : index
    %c0_19 = arith.constant 0 : index
    %47 = vector.load %arg6[%c0_18, %c0_19] : memref<2x64xf32, #tpu.memory_space<vmem>>, vector<2x64xf32>
    tpu.vector_store %arg6[%c0_18, %c0_19], %46 {strides = array<i32>} : memref<2x64xf32, #tpu.memory_space<vmem>>, vector<2x64xf32>,
    %48 = vector.broadcast %39 : vector<2x1xf32> to vector<2x64xf32>
    %49 = arith.mulf %48, %35 : vector<2x64xf32>
    %cst_20 = arith.constant 1.000000e+00 : f32
    %50 = vector.broadcast %cst_20 : f32 to vector<2x1xf32>
    %51 = arith.subf %50, %39 : vector<2x1xf32>
    %52 = vector.broadcast %51 : vector<2x1xf32> to vector<2x64xf32>
    %53 = arith.mulf %52, %4 : vector<2x64xf32>
    %54 = arith.addf %49, %53 : vector<2x64xf32>
    %c0_21 = arith.constant 0 : index
    %c0_22 = arith.constant 0 : index
    %55 = vector.load %arg7[%c0_21, %c0_22] : memref<2x64xf32, #tpu.memory_space<vmem>>, vector<2x64xf32>
    tpu.vector_store %arg7[%c0_21, %c0_22], %54 {strides = array<i32>} : memref<2x64xf32, #tpu.memory_space<vmem>>, vector<2x64xf32>,
    %56 = vector.broadcast %39 : vector<2x1xf32> to vector<2x64xf32>
    %57 = arith.mulf %56, %37 : vector<2x64xf32>
    %58 = vector.shape_cast %57 : vector<2x64xf32> to vector<1x2x64xf32>
    %c0_23 = arith.constant 0 : index
    %c0_24 = arith.constant 0 : index
    %c0_25 = arith.constant 0 : index
    %59 = vector.load %arg5[%c0_23, %c0_24, %c0_25] : memref<1x2x64xf32, #tpu.memory_space<vmem>>, vector<1x2x64xf32>
    tpu.vector_store %arg5[%c0_23, %c0_24, %c0_25], %58 {strides = array<i32>} : memref<1x2x64xf32, #tpu.memory_space<vmem>>, vector<1x2x64xf32>,
    return
  }
  func.func @transform_0(%arg0: i32) -> (i32, i32, i32) {
    %c0_i32 = arith.constant 0 : i32
    %c0_i32_0 = arith.constant 0 : i32
    %c0_i32_1 = arith.constant 0 : i32
    return %arg0, %c0_i32, %c0_i32_0 : i32, i32, i32
  }
  func.func @transform_1(%arg0: i32) -> (i32, i32, i32) {
    %c0_i32 = arith.constant 0 : i32
    %c0_i32_0 = arith.constant 0 : i32
    %c0_i32_1 = arith.constant 0 : i32
    return %arg0, %c0_i32, %c0_i32_0 : i32, i32, i32
  }
  func.func @transform_2(%arg0: i32) -> (i32, i32) {
    %c0_i32 = arith.constant 0 : i32
    %c0_i32_0 = arith.constant 0 : i32
    %c0_i32_1 = arith.constant 0 : i32
    return %c0_i32, %c0_i32_0 : i32, i32
  }
  func.func @transform_3(%arg0: i32) -> (i32, i32) {
    %c0_i32 = arith.constant 0 : i32
    %c0_i32_0 = arith.constant 0 : i32
    %c0_i32_1 = arith.constant 0 : i32
    return %c0_i32, %c0_i32_0 : i32, i32
  }
  func.func @transform_4(%arg0: i32) -> (i32, i32, i32) {
    %c0_i32 = arith.constant 0 : i32
    %c0_i32_0 = arith.constant 0 : i32
    %c0_i32_1 = arith.constant 0 : i32
    return %arg0, %c0_i32, %c0_i32_0 : i32, i32, i32
  }
}

module attributes {stable_mosaic.version = 11 : i64} {
  func.func @_mm_kernel(%arg0: i32, %arg1: memref<14x64xf32, #tpu.memory_space<vmem>>, %arg2: memref<64x256xbf16, #tpu.memory_space<vmem>>, %arg3: memref<1x256xf32, #tpu.memory_space<vmem>>, %arg4: memref<14x256xf32, #tpu.memory_space<vmem>>) attributes {dimension_semantics = [#tpu.dimension_semantics<parallel>], iteration_bounds = array<i64: 1>, scalar_prefetch = 0 : i64, scratch_operands = 0 : i64, tpu.core_type = #tpu.core_type<tc>, window_params = [{transform_indices = @transform_0, window_bounds = array<i64: 14, 64>}, {pipeline_mode = #tpu.pipeline_mode<synchronous>, transform_indices = @transform_1, window_bounds = array<i64: 64, 256>}, {pipeline_mode = #tpu.pipeline_mode<synchronous>, transform_indices = @transform_2, window_bounds = array<i64: 1, 256>}, {transform_indices = @transform_3, window_bounds = array<i64: 14, 256>}]} {
    %c0 = arith.constant 0 : index
    %c0_0 = arith.constant 0 : index
    %0 = vector.load %arg1[%c0, %c0_0] : memref<14x64xf32, #tpu.memory_space<vmem>>, vector<14x64xf32>
    %1 = arith.truncf %0 : vector<14x64xf32> to vector<14x64xbf16>
    %c0_1 = arith.constant 0 : index
    %c0_2 = arith.constant 0 : index
    %2 = vector.load %arg2[%c0_1, %c0_2] : memref<64x256xbf16, #tpu.memory_space<vmem>>, vector<64x256xbf16>
    %cst = arith.constant dense<0.000000e+00> : vector<14x256xf32>
    %3 = tpu.matmul %1, %2, %cst {dimension_numbers = #tpu.dot_dimension_numbers<[1], [0], [0], [1], [0, 0, 1, 1], [], []>} : vector<14x64xbf16>, vector<64x256xbf16>, vector<14x256xf32> -> vector<14x256xf32>
    %c0_3 = arith.constant 0 : index
    %c0_4 = arith.constant 0 : index
    %4 = vector.load %arg3[%c0_3, %c0_4] : memref<1x256xf32, #tpu.memory_space<vmem>>, vector<1x256xf32>
    %5 = vector.broadcast %4 : vector<1x256xf32> to vector<14x256xf32>
    %6 = arith.addf %3, %5 : vector<14x256xf32>
    %c0_5 = arith.constant 0 : index
    %c0_6 = arith.constant 0 : index
    %7 = vector.load %arg4[%c0_5, %c0_6] : memref<14x256xf32, #tpu.memory_space<vmem>>, vector<14x256xf32>
    tpu.vector_store %arg4[%c0_5, %c0_6], %6 {strides = array<i32>} : memref<14x256xf32, #tpu.memory_space<vmem>>, vector<14x256xf32>,
    return
  }
  func.func @transform_0(%arg0: i32) -> (i32, i32) {
    %c0_i32 = arith.constant 0 : i32
    %c0_i32_0 = arith.constant 0 : i32
    return %arg0, %c0_i32 : i32, i32
  }
  func.func @transform_1(%arg0: i32) -> (i32, i32) {
    %c0_i32 = arith.constant 0 : i32
    %c0_i32_0 = arith.constant 0 : i32
    %c0_i32_1 = arith.constant 0 : i32
    return %c0_i32, %c0_i32_0 : i32, i32
  }
  func.func @transform_2(%arg0: i32) -> (i32, i32) {
    %c0_i32 = arith.constant 0 : i32
    %c0_i32_0 = arith.constant 0 : i32
    %c0_i32_1 = arith.constant 0 : i32
    return %c0_i32, %c0_i32_0 : i32, i32
  }
  func.func @transform_3(%arg0: i32) -> (i32, i32) {
    %c0_i32 = arith.constant 0 : i32
    %c0_i32_0 = arith.constant 0 : i32
    return %arg0, %c0_i32 : i32, i32
  }
}

module attributes {stable_mosaic.version = 11 : i64} {
  func.func @_mm_kernel(%arg0: i32, %arg1: memref<14x64xf32, #tpu.memory_space<vmem>>, %arg2: memref<64x128xbf16, #tpu.memory_space<vmem>>, %arg3: memref<1x128xf32, #tpu.memory_space<vmem>>, %arg4: memref<14x128xbf16, #tpu.memory_space<vmem>>) attributes {dimension_semantics = [#tpu.dimension_semantics<parallel>], iteration_bounds = array<i64: 1>, scalar_prefetch = 0 : i64, scratch_operands = 0 : i64, tpu.core_type = #tpu.core_type<tc>, window_params = [{transform_indices = @transform_0, window_bounds = array<i64: 14, 64>}, {pipeline_mode = #tpu.pipeline_mode<synchronous>, transform_indices = @transform_1, window_bounds = array<i64: 64, 128>}, {pipeline_mode = #tpu.pipeline_mode<synchronous>, transform_indices = @transform_2, window_bounds = array<i64: 1, 128>}, {transform_indices = @transform_3, window_bounds = array<i64: 14, 128>}]} {
    %c0 = arith.constant 0 : index
    %c0_0 = arith.constant 0 : index
    %0 = vector.load %arg1[%c0, %c0_0] : memref<14x64xf32, #tpu.memory_space<vmem>>, vector<14x64xf32>
    %1 = arith.truncf %0 : vector<14x64xf32> to vector<14x64xbf16>
    %c0_1 = arith.constant 0 : index
    %c0_2 = arith.constant 0 : index
    %2 = vector.load %arg2[%c0_1, %c0_2] : memref<64x128xbf16, #tpu.memory_space<vmem>>, vector<64x128xbf16>
    %cst = arith.constant dense<0.000000e+00> : vector<14x128xf32>
    %3 = tpu.matmul %1, %2, %cst {dimension_numbers = #tpu.dot_dimension_numbers<[1], [0], [0], [1], [0, 0, 1, 1], [], []>} : vector<14x64xbf16>, vector<64x128xbf16>, vector<14x128xf32> -> vector<14x128xf32>
    %c0_3 = arith.constant 0 : index
    %c0_4 = arith.constant 0 : index
    %4 = vector.load %arg3[%c0_3, %c0_4] : memref<1x128xf32, #tpu.memory_space<vmem>>, vector<1x128xf32>
    %5 = vector.broadcast %4 : vector<1x128xf32> to vector<14x128xf32>
    %6 = arith.addf %3, %5 : vector<14x128xf32>
    %7 = arith.truncf %6 : vector<14x128xf32> to vector<14x128xbf16>
    %c0_5 = arith.constant 0 : index
    %c0_6 = arith.constant 0 : index
    %8 = vector.load %arg4[%c0_5, %c0_6] : memref<14x128xbf16, #tpu.memory_space<vmem>>, vector<14x128xbf16>
    tpu.vector_store %arg4[%c0_5, %c0_6], %7 {strides = array<i32>} : memref<14x128xbf16, #tpu.memory_space<vmem>>, vector<14x128xbf16>,
    return
  }
  func.func @transform_0(%arg0: i32) -> (i32, i32) {
    %c0_i32 = arith.constant 0 : i32
    %c0_i32_0 = arith.constant 0 : i32
    return %arg0, %c0_i32 : i32, i32
  }
  func.func @transform_1(%arg0: i32) -> (i32, i32) {
    %c0_i32 = arith.constant 0 : i32
    %c0_i32_0 = arith.constant 0 : i32
    %c0_i32_1 = arith.constant 0 : i32
    return %c0_i32, %c0_i32_0 : i32, i32
  }
  func.func @transform_2(%arg0: i32) -> (i32, i32) {
    %c0_i32 = arith.constant 0 : i32
    %c0_i32_0 = arith.constant 0 : i32
    %c0_i32_1 = arith.constant 0 : i32
    return %c0_i32, %c0_i32_0 : i32, i32
  }
  func.func @transform_3(%arg0: i32) -> (i32, i32) {
    %c0_i32 = arith.constant 0 : i32
    %c0_i32_0 = arith.constant 0 : i32
    return %arg0, %c0_i32 : i32, i32
  }
}

module attributes {stable_mosaic.version = 11 : i64} {
  func.func @_joint_kernel(%arg0: i32, %arg1: i32, %arg2: memref<1x8x128xbf16, #tpu.memory_space<vmem>>, %arg3: memref<1x8x128xbf16, #tpu.memory_space<vmem>>, %arg4: memref<128x128xbf16, #tpu.memory_space<vmem>>, %arg5: memref<1x128xf32, #tpu.memory_space<vmem>>, %arg6: memref<1x8x7x128xbf16, #tpu.memory_space<vmem>>) attributes {dimension_semantics = [#tpu.dimension_semantics<parallel>, #tpu.dimension_semantics<parallel>], iteration_bounds = array<i64: 2, 1>, scalar_prefetch = 0 : i64, scratch_operands = 0 : i64, tpu.core_type = #tpu.core_type<tc>, window_params = [{transform_indices = @transform_0, window_bounds = array<i64: 1, 8, 128>}, {transform_indices = @transform_1, window_bounds = array<i64: 1, 8, 128>}, {pipeline_mode = #tpu.pipeline_mode<synchronous>, transform_indices = @transform_2, window_bounds = array<i64: 128, 128>}, {pipeline_mode = #tpu.pipeline_mode<synchronous>, transform_indices = @transform_3, window_bounds = array<i64: 1, 128>}, {transform_indices = @transform_4, window_bounds = array<i64: 1, 8, 7, 128>}]} {
    %c0 = arith.constant 0 : index
    %c0_0 = arith.constant 0 : index
    %c0_1 = arith.constant 0 : index
    %0 = vector.load %arg2[%c0, %c0_0, %c0_1] : memref<1x8x128xbf16, #tpu.memory_space<vmem>>, vector<1x8x128xbf16>
    %1 = vector.shape_cast %0 : vector<1x8x128xbf16> to vector<8x128xbf16>
    %c0_2 = arith.constant 0 : index
    %c0_3 = arith.constant 0 : index
    %c0_4 = arith.constant 0 : index
    %2 = vector.load %arg3[%c0_2, %c0_3, %c0_4] : memref<1x8x128xbf16, #tpu.memory_space<vmem>>, vector<1x8x128xbf16>
    %3 = vector.shape_cast %2 : vector<1x8x128xbf16> to vector<8x128xbf16>
    %4 = vector.shape_cast %1 : vector<8x128xbf16> to vector<8x1x128xbf16>
    %5 = vector.shape_cast %3 : vector<8x128xbf16> to vector<1x8x128xbf16>
    %6 = vector.broadcast %4 : vector<8x1x128xbf16> to vector<8x8x128xbf16>
    %7 = vector.broadcast %5 : vector<1x8x128xbf16> to vector<8x8x128xbf16>
    %8 = arith.addf %6, %7 : vector<8x8x128xbf16>
    %cst = arith.constant 0.000000e+00 : bf16
    %9 = vector.broadcast %cst : bf16 to vector<8x8x128xbf16>
    %10 = arith.maximumf %8, %9 : vector<8x8x128xbf16>
    %11 = vector.shape_cast %10 : vector<8x8x128xbf16> to vector<64x128xbf16>
    %c0_5 = arith.constant 0 : index
    %c0_6 = arith.constant 0 : index
    %12 = vector.load %arg4[%c0_5, %c0_6] : memref<128x128xbf16, #tpu.memory_space<vmem>>, vector<128x128xbf16>
    %cst_7 = arith.constant dense<0.000000e+00> : vector<64x128xf32>
    %13 = tpu.matmul %11, %12, %cst_7 {dimension_numbers = #tpu.dot_dimension_numbers<[1], [0], [0], [1], [0, 0, 1, 1], [], []>} : vector<64x128xbf16>, vector<128x128xbf16>, vector<64x128xf32> -> vector<64x128xf32>
    %c0_8 = arith.constant 0 : index
    %c0_9 = arith.constant 0 : index
    %14 = vector.load %arg5[%c0_8, %c0_9] : memref<1x128xf32, #tpu.memory_space<vmem>>, vector<1x128xf32>
    %15 = vector.broadcast %14 : vector<1x128xf32> to vector<64x128xf32>
    %16 = arith.addf %13, %15 : vector<64x128xf32>
    %cst_10 = arith.constant dense<0xFF800000> : vector<64xf32>
    %17 = vector.multi_reduction <maximumf>, %16, %cst_10 [1] : vector<64x128xf32> to vector<64xf32>
    %18 = vector.shape_cast %17 : vector<64xf32> to vector<64x1xf32>
    %19 = vector.broadcast %18 : vector<64x1xf32> to vector<64x128xf32>
    %20 = arith.subf %16, %19 : vector<64x128xf32>
    %21 = math.exp %20 : vector<64x128xf32>
    %cst_11 = arith.constant dense<0.000000e+00> : vector<64xf32>
    %22 = vector.multi_reduction <add>, %21, %cst_11 [1] : vector<64x128xf32> to vector<64xf32>
    %23 = vector.shape_cast %22 : vector<64xf32> to vector<64x1xf32>
    %24 = math.log %23 : vector<64x1xf32>
    %25 = arith.addf %24, %18 : vector<64x1xf32>
    %26 = vector.broadcast %25 : vector<64x1xf32> to vector<64x128xf32>
    %27 = arith.subf %16, %26 : vector<64x128xf32>
    %28 = vector.shape_cast %27 : vector<64x128xf32> to vector<8x8x128xf32>
    %29 = vector.extract_strided_slice %28 {offsets = [0, 0, 0], sizes = [8, 7, 128], strides = [1, 1, 1]} : vector<8x8x128xf32> to vector<8x7x128xf32>
    %30 = arith.truncf %29 : vector<8x7x128xf32> to vector<8x7x128xbf16>
    %31 = vector.shape_cast %30 : vector<8x7x128xbf16> to vector<1x8x7x128xbf16>
    %c0_12 = arith.constant 0 : index
    %c0_13 = arith.constant 0 : index
    %c0_14 = arith.constant 0 : index
    %c0_15 = arith.constant 0 : index
    %32 = vector.load %arg6[%c0_12, %c0_13, %c0_14, %c0_15] : memref<1x8x7x128xbf16, #tpu.memory_space<vmem>>, vector<1x8x7x128xbf16>
    tpu.vector_store %arg6[%c0_12, %c0_13, %c0_14, %c0_15], %31 {strides = array<i32>} : memref<1x8x7x128xbf16, #tpu.memory_space<vmem>>, vector<1x8x7x128xbf16>,
    return
  }
  func.func @transform_0(%arg0: i32, %arg1: i32) -> (i32, i32, i32) {
    %c0_i32 = arith.constant 0 : i32
    %c0_i32_0 = arith.constant 0 : i32
    return %arg0, %arg1, %c0_i32 : i32, i32, i32
  }
  func.func @transform_1(%arg0: i32, %arg1: i32) -> (i32, i32, i32) {
    %c0_i32 = arith.constant 0 : i32
    %c0_i32_0 = arith.constant 0 : i32
    %c0_i32_1 = arith.constant 0 : i32
    return %arg0, %c0_i32, %c0_i32_0 : i32, i32, i32
  }
  func.func @transform_2(%arg0: i32, %arg1: i32) -> (i32, i32) {
    %c0_i32 = arith.constant 0 : i32
    %c0_i32_0 = arith.constant 0 : i32
    %c0_i32_1 = arith.constant 0 : i32
    return %c0_i32, %c0_i32_0 : i32, i32
  }
  func.func @transform_3(%arg0: i32, %arg1: i32) -> (i32, i32) {
    %c0_i32 = arith.constant 0 : i32
    %c0_i32_0 = arith.constant 0 : i32
    %c0_i32_1 = arith.constant 0 : i32
    return %c0_i32, %c0_i32_0 : i32, i32
  }
  func.func @transform_4(%arg0: i32, %arg1: i32) -> (i32, i32, i32, i32) {
    %c0_i32 = arith.constant 0 : i32
    %c0_i32_0 = arith.constant 0 : i32
    %c0_i32_1 = arith.constant 0 : i32
    return %arg0, %arg1, %c0_i32, %c0_i32_0 : i32, i32, i32, i32
  }
}

</mosaic_0001>

<bundles_post_ra>
// kernel: transducer_forward.14
= control target key start
LH: loop header
LB: loop body
LE: loop exit
PB: predicated region body
PF: predicated region fallthrough
CT: control target
= control target key end

     0   :  { %s1017_s30 = smov 0   ;;  %s1176_s0 = inlined_call_operand.vmem [shape: f32[8,2,192], index: 0, kind: input, shape index: {}]   ;;  %s1177_s1 = inlined_call_operand.vmem [shape: f32[8,2,192], index: 1, kind: input, shape index: {}]   ;;  %s1178_s2 = inlined_call_operand.vmem [shape: f32[8,2,1], index: 2, kind: input, shape index: {}, may-alias: {2,3}]   ;;  %s1179_s3 = inlined_call_operand.vmem [shape: f32[8,2,1], index: 3, kind: input, shape index: {}, may-alias: {2,3}]   ;;  %s1180_s4 = inlined_call_operand.vmem [shape: f32[64,192], index: 4, kind: input, shape index: {}]   ;;  %s1181_s5 = inlined_call_operand.vmem [shape: f32[64,192], index: 5, kind: input, shape index: {}]   ;;  %s1182_s6 = inlined_call_operand.vmem [shape: f32[1,192], index: 6, kind: input, shape index: {}]   ;;  %s1183_s7 = inlined_call_operand.vmem [shape: f32[1,192], index: 7, kind: input, shape index: {}]   ;;  %s1184_s8 = inlined_call_operand.vmem [shape: f32[8,2,64], index: 8, kind: output, shape index: {0}]   ;;  %s1185_s9 = inlined_call_operand.vmem [shape: f32[8,2,64], index: 9, kind: output, shape index: {1}]  }
   0x1 LB: > { %s873_s10 = sadd.s32 4294967295, %s960_s30   ;;  %p877_p0 = scmp.ge.s32.totalorder %s960_s30, 1  ;;  %s960_s30 = sphi %s1017_s30, %s20_s30  }
   0x2   : > { %p328_p1 = scmp.lt.s32.totalorder %s960_s30, 9 }
   0x4   : > { %p329_p2 = pnand %p877_p0, %p328_p1 }
   0x5   : > { %p383_p3 = scmp.lt.s32.totalorder (!%p329_p2), %s873_s10, 7  ;;  %s388_s11 = ssub.s32 (!%p329_p2), 7, %s873_s10 }
   0x6   : > { %332 = sbr.rel (%p329_p2) target bundleno = 543 (0x21f), region = 52  ;;  %p389_p4 = scmp.lt.s32.totalorder (!%p329_p2), %s388_s11, 7 }
   0x7   : > { %p886_p5 = scmp.ne.s32.totalorder (!%p329_p2), %s873_s10, 0 }
   0xd   : > { %s384_s12 = scalar_select %p383_p3, %s873_s10, 7 }
   0xe   : > { %s1187_s11 = smov (!%p389_p4, %s388_s11), 7  ;;  %418 = sbr.rel (%p886_p5) target bundleno = 21 (0x15), region = 56 }
   0xf   : > { %s893_s13 = sshll.u32 %s384_s12, 2  ;;  %s882_s14 = sshll.u32 %s384_s12, 1  ;;  %vm419_vm0 = vcmask (!%p886_p5), 517120   ;;  %v962_v0 = vmov (!%p886_p5), 0.0  }
  0x10   : > { %s1028_s17 = scalar_lea.vmem %s1176_s0, %s893_s13  ;;  %s894_s18 = sshll.u32 %s1187_s11, 2  ;;  %420 = vst.msk [vmem:[#allocation2] sm:$0x3] (!%p886_p5), %vm419_vm0, %v962_v0  ;;  %421 = vst.msk [vmem:[#allocation3] sm:$0x3] (!%p886_p5), %vm419_vm0, %v962_v0 }
  0x11   : > { %s1033_s21 = scalar_lea.vmem %s1177_s1, %s894_s18  ;;  %s1038_s24 = scalar_lea.vmem %s1178_s2, %s882_s14 }
  0x12   : > { %s883_s25 = sshll.u32 %s1187_s11, 1  ;;  %s1043_s28 = scalar_lea.vmem %s1184_s8, %s882_s14 }
  0x13   : > { %s1048_s13 = scalar_lea.vmem %s1179_s3, %s883_s25  ;;  %s1053_s18 = scalar_lea.vmem %s1185_s9, %s883_s25 }
  0x15 PF: > { %v425_v1 = vld [vmem:[%s1180_s4 + $0x8] sm:$0xff]  ;;  %v427_v2 = vld [vmem:[%s1180_s4 + $0x18] sm:$0xff]  ;;  %v424_v6 = vld [vmem:[%s1180_s4] sm:$0xff]  ;;  %v963_v8 = vmov 0.0   ;;  %vm452_vm1 = vcmask 523264   ;;  %v964_v52 = vmov 0   ;;  %v442_v53 = vlaneseq }
  0x16   : > { %v590_v3 = vld [vmem:[%s1181_s5 + $0x8] sm:$0xff]  ;;  %v895_v4 = vpack.c.bf16 %v427_v2, %v425_v1  ;;  %v592_v5 = vld [vmem:[%s1181_s5 + $0x18] sm:$0xff]  ;;  %v426_v7 = vld [vmem:[%s1180_s4 + $0x10] sm:$0xff]  ;;  %520 = vmatprep.mubr.f32.mxu0 %v963_v8  ;;  %684 = vmatprep.mubr.f32.mxu1 %v963_v8  ;;  %vm584_vm2 = vcmask 517120  }
  0x17   : > { %v911_v9 = vpack.c.bf16 %v592_v5, %v590_v3  ;;  %v897_v10 = vpack.c.bf16 %v426_v7, %v424_v6  ;;  %v589_v11 = vld [vmem:[%s1181_s5] sm:$0xff]  ;;  %v591_v12 = vld [vmem:[%s1181_s5 + $0x10] sm:$0xff]  ;;  %v429_v13 = vld [vmem:[%s1180_s4 + $0x28] sm:$0xff]  ;;  %941 = vset.pattern.permute.xlu1 %v964_v52  ;;  %940 = vset.pattern.permute.xlu0 %v964_v52  ;;  %v443_v54 = vshrl.u32 %v442_v53, 7 }
  0x18   : > { %896 = vmatprep.subr.bf16.mxu0 %v895_v4  ;;  %v913_v14 = vpack.c.bf16 %v591_v12, %v589_v11  ;;  %v431_v15 = vld [vmem:[%s1180_s4 + $0x38] sm:$0xff]  ;;  %v594_v16 = vld [vmem:[%s1181_s5 + $0x28] sm:$0xff]  ;;  %v428_v20 = vld [vmem:[%s1180_s4 + $0x20] sm:$0xff] }
  0x19   : > { %v596_v17 = vld [vmem:[%s1181_s5 + $0x38] sm:$0xff]  ;;  %912 = vmatprep.subr.bf16.mxu1 %v911_v9  ;;  %898 = vmatpush1.bf16.msra.mxu0 %v897_v10  ;;  %v899_v18 = vpack.c.bf16 %v431_v15, %v429_v13  ;;  %v430_v21 = vld [vmem:[%s1180_s4 + $0x30] sm:$0xff]  ;;  %v593_v22 = vld [vmem:[%s1181_s5 + $0x20] sm:$0xff]  ;;  %v444_v55 = vsub.s32 0, %v443_v54  ;;  %v448_v12 = vsub.s32 1, %v443_v54 }
  0x1a   : > { %v915_v19 = vpack.c.bf16 %v596_v17, %v594_v16  ;;  %914 = vmatpush1.bf16.msra.mxu1 %v913_v14  ;;  %v901_v23 = vpack.c.bf16 %v430_v21, %v428_v20  ;;  %v595_v24 = vld [vmem:[%s1181_s5 + $0x30] sm:$0xff]  ;;  %v433_v25 = vld [vmem:[%s1180_s4 + $0x48] sm:$0xff]  ;;  %v435_v26 = vld [vmem:[%s1180_s4 + $0x58] sm:$0xff] }
  0x1b   : > { %900 = vmatprep.subr.bf16.mxu0 %v899_v18  ;;  %v917_v27 = vpack.c.bf16 %v595_v24, %v593_v22  ;;  %v903_v28 = vpack.c.bf16 %v435_v26, %v433_v25  ;;  %v598_v29 = vld [vmem:[%s1181_s5 + $0x48] sm:$0xff]  ;;  %v600_v30 = vld [vmem:[%s1181_s5 + $0x58] sm:$0xff]  ;;  %v432_v31 = vld [vmem:[%s1180_s4 + $0x40] sm:$0xff]  ;;  %v965_v25 = vmov 1983009808  }
  0x1c   : > { %916 = vmatprep.subr.bf16.mxu1 %v915_v19  ;;  %v919_v32 = vpack.c.bf16 %v600_v30, %v598_v29  ;;  %v434_v33 = vld [vmem:[%s1180_s4 + $0x50] sm:$0xff]  ;;  %v597_v34 = vld [vmem:[%s1181_s5 + $0x40] sm:$0xff]  ;;  %v437_v37 = vld [vmem:[%s1180_s4 + $0x68] sm:$0xff]  ;;  %v547_v26 = vunpack.c.l.s4 %v965_v25 }
  0x1d   : > { %v599_v35 = vld [vmem:[%s1181_s5 + $0x50] sm:$0xff]  ;;  %902 = vmatpush1.bf16.msra.mxu0 %v901_v23  ;;  %v905_v36 = vpack.c.bf16 %v434_v33, %v432_v31  ;;  %v439_v38 = vld [vmem:[%s1180_s4 + $0x78] sm:$0xff]  ;;  %v602_v39 = vld [vmem:[%s1181_s5 + $0x68] sm:$0xff] }
  0x1e   : > { %918 = vmatpush1.bf16.msra.mxu1 %v917_v27  ;;  %904 = vmatprep.subr.bf16.mxu0 %v903_v28  ;;  %v921_v40 = vpack.c.bf16 %v599_v35, %v597_v34  ;;  %v907_v41 = vpack.c.bf16 %v439_v38, %v437_v37  ;;  %v604_v42 = vld [vmem:[%s1181_s5 + $0x78] sm:$0xff]  ;;  %v436_v43 = vld [vmem:[%s1180_s4 + $0x60] sm:$0xff]  ;;  %v438_v44 = vld [vmem:[%s1180_s4 + $0x70] sm:$0xff]  ;;  %v548_v27 = vunpack.c.0.s8 %v547_v26 }
  0x1f   : > { %920 = vmatprep.subr.bf16.mxu1 %v919_v32  ;;  %v923_v45 = vpack.c.bf16 %v604_v42, %v602_v39  ;;  %v601_v46 = vld [vmem:[%s1181_s5 + $0x60] sm:$0xff]  ;;  %v603_v47 = vld [vmem:[%s1181_s5 + $0x70] sm:$0xff]  ;;  %v909_v48 = vpack.c.bf16 %v438_v44, %v436_v43 }
  0x20   : > { %v925_v49 = vpack.c.bf16 %v603_v47, %v601_v46  ;;  %v1151_v50 = vld [vmem:[#allocation2] sm:$0x3]  ;;  %v1153_v51 = vld [vmem:[#allocation3] sm:$0x3]  ;;  %v551_v28 = vsub.s32 %v548_v27, %v443_v54 }
  0x21   : > { %906 = vmatpush1.bf16.msra.mxu0 %v905_v36  ;;  %v440_v56 = vld [vmem:[%s1182_s6] sm:$0x3] }
  0x22   : > { %922 = vmatpush1.bf16.msra.mxu1 %v921_v40  ;;  %908 = vmatprep.subr.bf16.mxu0 %v907_v41  ;;  %v605_v57 = vld [vmem:[%s1183_s7] sm:$0x3]  ;;  %v445_v58 = vrot.slane %v440_v56, %v444_v55  ;;  %v449_v13 = vrot.slane %v440_v56, %v448_v12  ;;  %v552_v31 = vrot.slane %v1151_v50, %v551_v28 }
  0x23   : > { %924 = vmatprep.subr.bf16.mxu1 %v923_v45  ;;  %v610_v59 = vrot.slane %v605_v57, %v444_v55  ;;  %v423_v60 = vld [vmem:[%s1028_s17] sm:$0xf]  ;;  %v614_v14 = vrot.slane %v605_v57, %v448_v12  ;;  %s966_s17 = smov 64   ;;  %v716_v32 = vrot.slane %v1153_v51, %v551_v28 }
  0x24   : > { %v588_v63 = vld [vmem:[%s1033_s21] sm:$0xf]  ;;  %v536_v15 = vrot.slane %v423_v60, 2 }
  0x25   : > { %910 = vmatpush1.bf16.msra.mxu0 %v909_v48  ;;  %v700_v18 = vrot.slane %v588_v63, 2  ;;  %v558_v33 = vld [vmem:[%s1038_s24] sm:$0x3] }
  0x26   : > { %926 = vmatpush1.bf16.msra.mxu1 %v925_v49  ;;  %v576_v34 = vsub.f32 1.0, %v558_v33  ;;  %v722_v35 = vld [vmem:[%s1048_s13] sm:$0x3] }
  0x27   : > { %v740_v36 = vsub.f32 1.0, %v722_v35 }
  0x28   : > { %887 = vmatmul.mubr.msk.f32.vlgmr.msra.gmra.mrb[0].mxu0 %vm452_vm1, %v1151_v50 }
  0x29   : > { %889 = vmatmul.mubr.msk.f32.vlgmr.msra.gmra.mrb[0].mxu1 %vm452_vm1, %v1153_v51 }
  0xfb   : > { %v522_v61 = vpop.f32.mrb[0].mxu0 }
  0xfc   : > { %v523_v62 = vadd.f32 %v522_v61, %v445_v58  ;;  %v686_v0 = vpop.f32.mrb[0].mxu1  ;;  %v524_v1 = vpop.f32.mrb[1].mxu0 }
  0xfd   : > { %v687_v2 = vadd.f32 %v686_v0, %v610_v59  ;;  %v688_v3 = vpop.f32.mrb[1].mxu1  ;;  %v525_v16 = vadd.f32 %v524_v1, %v449_v13 }
  0xfe   : > { %v527_v4 = vadd.f32 %v523_v62, %v423_v60  ;;  %v689_v19 = vadd.f32 %v688_v3, %v614_v14 }
  0xff   : > { %v691_v5 = vadd.f32 %v687_v2, %v588_v63 }
 0x100   : > { %v888_v6 = vmul.f32 -1.442695, %v527_v4 }
 0x101   : > { %v890_v7 = vmul.f32 -1.442695, %v691_v5 }
 0x102   : > { %942 = vpow2.f32 %v888_v6 }
 0x103   : > { %944 = vpow2.f32 %v890_v7 }
 0x10c   : > { %v943_v8 = vpop.eup %942 }
 0x10d   : > { %v945_v9 = vpop.eup %944  ;;  %v531_v10 = vadd.f32 1.0, %v943_v8 }
 0x10e   : > { %v695_v11 = vadd.f32 1.0, %v945_v9 }
 0x10f   : > { %946 = vrcp.f32 %v531_v10 }
 0x110   : > { %948 = vrcp.f32 %v695_v11 }
 0x119   : > { %v947_v17 = vpop.eup %946 }
 0x11a   : > { %v949_v20 = vpop.eup %948  ;;  %v534_v21 = vmul.f32 %v947_v17, %v525_v16  ;;  %v540_v39 = vsub.f32 1.0, %v947_v17 }
 0x11b   : > { %v698_v22 = vmul.f32 %v949_v20, %v689_v19  ;;  %v704_v40 = vsub.f32 1.0, %v949_v20 }
 0x11c   : > { %v538_v23 = vadd.f32 %v536_v15, %v534_v21 }
 0x11d   : > { %v702_v24 = vadd.f32 %v700_v18, %v698_v22 }
 0x11e   : > { %950 = vtanh.f32 %v538_v23 }
 0x11f   : > { %952 = vtanh.f32 %v702_v24 }
 0x128   : > { %v951_v29 = vpop.eup %950 }
 0x129   : > { %v953_v30 = vpop.eup %952  ;;  %542 = vrot.lane.b32.xlu0 %v951_v29, %s966_s17 }
 0x12a   : > { %706 = vrot.lane.b32.xlu1 %v953_v30, %s966_s17 }
 0x12d   : > { %553 = vrot.lane.b32.xlu0 %v552_v31, %s966_s17 }
 0x12e   : > { %717 = vrot.lane.b32.xlu1 %v716_v32, %s966_s17 }
 0x131   : > { %561 = vperm.xlu0 %940, %v558_v33  }
 0x132   : > { %579 = vperm.xlu1 %941, %v576_v34  }
 0x135   : > { %743 = vperm.xlu0 %940, %v740_v36  }
 0x136   : > { %725 = vperm.xlu1 %941, %v722_v35  }
 0x19b   : > { %v543_v37 = vpop.permute.xlu0 %542 }
 0x19c   : > { %v707_v38 = vpop.permute.xlu1 %706  ;;  %v545_v42 = vmul.f32 %v543_v37, %v540_v39 }
 0x19d   : > { %v709_v45 = vmul.f32 %v707_v38, %v704_v40 }
 0x19f   : > { %v554_v41 = vpop.permute.xlu0 %553 }
 0x1a0   : > { %v718_v43 = vpop.permute.xlu1 %717  ;;  %v556_v44 = vmul.f32 %v947_v17, %v554_v41 }
 0x1a1   : > { %v720_v46 = vmul.f32 %v949_v20, %v718_v43 }
 0x1a2   : > { %v557_v47 = vadd.f32 %v556_v44, %v545_v42 }
 0x1a3   : > { %v721_v48 = vadd.f32 %v720_v46, %v709_v45 }
 0x1a4   : > { %v571_v49 = vrot.slane %v557_v47, %v551_v28 }
 0x1a5   : > { %v735_v52 = vrot.slane %v721_v48, %v551_v28 }
 0x1a6   : > { %572 = vrot.lane.b32.xlu1 %v571_v49, %s966_s17 }
 0x1a7   : > { %736 = vrot.lane.b32.xlu0 %v735_v52, %s966_s17 }
 0x1b0   : > { %v562_v54 = vpop.permute.xlu0 %561 }
 0x1b1   : > { %v580_v53 = vpop.permute.xlu1 %579 }
 0x1b2   : > { %v582_v58 = vmul.f32 %v580_v53, %v1151_v50 }
 0x1b4   : > { %v744_v56 = vpop.permute.xlu0 %743 }
 0x1b5   : > { %v726_v55 = vpop.permute.xlu1 %725  ;;  %v746_v61 = vmul.f32 %v744_v56, %v1153_v51 }
 0x218   : > { %v573_v57 = vpop.permute.xlu1 %572 }
 0x219   : > { %v575_v59 = vmul.f32 %v573_v57, %v562_v54  ;;  %v737_v60 = vpop.permute.xlu0 %736 }
 0x21a   : > { %v739_v62 = vmul.f32 %v737_v60, %v726_v55 }
 0x21b   : > { %v583_v63 = vadd.f32 %v582_v58, %v575_v59  ;;  %586 = vst.msk [vmem:[%s1043_s28] sm:$0x3] %vm584_vm2, %v575_v59 }
 0x21c   : > { %v747_v0 = vadd.f32 %v746_v61, %v739_v62  ;;  %749 = vst.msk [vmem:[%s1053_s18] sm:$0x3] %vm584_vm2, %v739_v62 }
 0x21d   : > { %585 = vst.msk [vmem:[#allocation2] sm:$0x3] %vm584_vm2, %v583_v63 }
 0x21e   : > { %748 = vst.msk [vmem:[#allocation3] sm:$0x3] %vm584_vm2, %v747_v0 }
 0x21f PF: > { %s20_s30 = sadd.s32 1, %s960_s30  }
 0x220   : > { %p17_p6 = scmp.ge.s32.totalorder %s20_s30, 10  }
 0x222   :  { %19 = sbr.rel (!%p17_p6) target bundleno = 1 (0x1), region = 107 }

// kernel: transducer_forward.13
= control target key start
LH: loop header
LB: loop body
LE: loop exit
PB: predicated region body
PF: predicated region fallthrough
CT: control target
= control target key end

     0   :  { %v815_v1 = vmov 0   ;;  %vm441_vm0 = vcmask 523264   ;;  %v816_v61 = vmov 0.0   ;;  %vm817_vm1 = vmmov 0   ;;  %s1063_s1 = inlined_call_operand.vmem [shape: bf16[320,384], index: 1, kind: input, shape index: {}]   ;;  %s1064_s0 = inlined_call_operand.vmem [shape: f32[16,320], index: 0, kind: input, shape index: {}]   ;;  %s1065_s2 = inlined_call_operand.vmem [shape: f32[1,384], index: 2, kind: input, shape index: {}]   ;;  %s1066_s3 = inlined_call_operand.vmem [shape: f32[16,384], index: 3, kind: output, shape index: {}]  }
   0x1   :  { %v735_v0 = vld [vmem:[%s1063_s1 + $0x4] ss:$12 sps:$4 sm:$0xff]   ;;  %520 = vmatprep.mubr.bf16.mxu1 %v815_v1  ;;  %v739_v3 = vld [vmem:[%s1063_s1] ss:$12 sps:$4 sm:$0xff]   ;;  %v741_v5 = vld [vmem:[%s1063_s1 + $0x1c] ss:$12 sps:$4 sm:$0xff]  }
   0x2   :  { %v737_v2 = vld [vmem:[%s1063_s1 + $0x184] ss:$12 sps:$4 sm:$0xff]   ;;  %445 = vmatprep.subr.bf16.mxu0 %v735_v0  ;;  %v740_v4 = vld [vmem:[%s1063_s1 + $0x180] ss:$12 sps:$4 sm:$0xff]   ;;  %v743_v6 = vld [vmem:[%s1063_s1 + $0x19c] ss:$12 sps:$4 sm:$0xff]  }
   0x3   :  { %488 = vmatprep.subr.bf16.mxu1 %v737_v2  ;;  %446 = vmatpush1.bf16.msra.mxu0 %v739_v3  ;;  %v745_v7 = vld [vmem:[%s1063_s1 + $0x18] ss:$12 sps:$4 sm:$0xff]   ;;  %v747_v9 = vld [vmem:[%s1063_s1 + $0x34] ss:$12 sps:$4 sm:$0xff]   ;;  %v751_v11 = vld [vmem:[%s1063_s1 + $0x30] ss:$12 sps:$4 sm:$0xff]  }
   0x4   :  { %489 = vmatpush1.bf16.msra.mxu1 %v740_v4  ;;  %447 = vmatprep.subr.bf16.mxu0 %v741_v5  ;;  %v746_v8 = vld [vmem:[%s1063_s1 + $0x198] ss:$12 sps:$4 sm:$0xff]   ;;  %v749_v10 = vld [vmem:[%s1063_s1 + $0x1b4] ss:$12 sps:$4 sm:$0xff]   ;;  %v752_v12 = vld [vmem:[%s1063_s1 + $0x1b0] ss:$12 sps:$4 sm:$0xff]  }
   0x5   :  { %490 = vmatprep.subr.bf16.mxu1 %v743_v6  ;;  %v753_v13 = vld [vmem:[%s1063_s1 + $0x4c] ss:$12 sps:$4 sm:$0xff]   ;;  %v757_v15 = vld [vmem:[%s1063_s1 + $0x48] ss:$12 sps:$4 sm:$0xff]   ;;  %v759_v17 = vld [vmem:[%s1063_s1 + $0x64] ss:$12 sps:$4 sm:$0xff]  }
   0x6   :  { %v755_v14 = vld [vmem:[%s1063_s1 + $0x1cc] ss:$12 sps:$4 sm:$0xff]   ;;  %v758_v16 = vld [vmem:[%s1063_s1 + $0x1c8] ss:$12 sps:$4 sm:$0xff]   ;;  %v772_v30 = vld [vmem:[%s1063_s1 + $0x90] ss:$12 sps:$4 sm:$0xff]  }
   0x7   :  { %448 = vmatpush1.bf16.msra.mxu0 %v745_v7  ;;  %v761_v18 = vld [vmem:[%s1063_s1 + $0xc8] ss:$12 sps:$4 sm:$0xff]   ;;  %v762_v21 = vld [vmem:[%s1063_s1 + $0x60] ss:$12 sps:$4 sm:$0xff]   ;;  %v767_v26 = vld [vmem:[%s1063_s1 + $0x78] ss:$12 sps:$4 sm:$0xff]  }
   0x8   :  { %491 = vmatpush1.bf16.msra.mxu1 %v746_v8  ;;  %449 = vmatprep.subr.bf16.mxu0 %v747_v9  ;;  %v17_v19 = vld [vmem:[%s1064_s0 + $0x10] sm:$0xff]  ;;  %v20_v20 = vld [vmem:[%s1064_s0 + $0x28] sm:$0xff]  ;;  %v771_v29 = vld [vmem:[%s1063_s1 + $0xf8] ss:$12 sps:$4 sm:$0xff]  }
   0x9   :  { %492 = vmatprep.subr.bf16.mxu1 %v749_v10  ;;  %v901_v22 = vpack.c.bf16 %v20_v20, %v17_v19  ;;  %v763_v23 = vld [vmem:[%s1063_s1 + $0x8] ss:$12 sps:$4 sm:$0xff]   ;;  %v766_v25 = vld [vmem:[%s1063_s1 + $0xe0] ss:$12 sps:$4 sm:$0xff]   ;;  %v773_v31 = vld [vmem:[%s1063_s1 + $0x38] ss:$12 sps:$4 sm:$0xff]  }
   0xa   :  { %v764_v24 = vld [vmem:[%s1063_s1 + $0x7c] ss:$12 sps:$4 sm:$0xff]   ;;  %v768_v27 = vld [vmem:[%s1063_s1 + $0x20] ss:$12 sps:$4 sm:$0xff]   ;;  %v779_v36 = vld [vmem:[%s1063_s1 + $0xc4] ss:$12 sps:$4 sm:$0xff]  }
   0xb   :  { %450 = vmatpush1.bf16.msra.mxu0 %v751_v11  ;;  %v769_v28 = vld [vmem:[%s1063_s1 + $0x94] ss:$12 sps:$4 sm:$0xff]   ;;  %v774_v32 = vld [vmem:[%s1063_s1 + $0xac] ss:$12 sps:$4 sm:$0xff]   ;;  %v776_v33 = vld [vmem:[%s1063_s1 + $0x110] ss:$12 sps:$4 sm:$0xff]   ;;  %v106_v11 = vlaneseq }
   0xc   :  { %493 = vmatpush1.bf16.msra.mxu1 %v752_v12  ;;  %451 = vmatprep.subr.bf16.mxu0 %v753_v13  ;;  %v777_v34 = vld [vmem:[%s1063_s1 + $0xa8] ss:$12 sps:$4 sm:$0xff]   ;;  %v778_v35 = vld [vmem:[%s1063_s1 + $0x50] ss:$12 sps:$4 sm:$0xff]   ;;  %v782_v38 = vld [vmem:[%s1063_s1 + $0xc0] ss:$12 sps:$4 sm:$0xff]  }
   0xd   :  { %494 = vmatprep.subr.bf16.mxu1 %v755_v14  ;;  %v781_v37 = vld [vmem:[%s1063_s1 + $0x128] ss:$12 sps:$4 sm:$0xff]   ;;  %v786_v41 = vld [vmem:[%s1063_s1 + $0x140] ss:$12 sps:$4 sm:$0xff]   ;;  %v787_v42 = vld [vmem:[%s1063_s1 + $0xd8] ss:$12 sps:$4 sm:$0xff]  }
   0xe   :  { %v783_v39 = vld [vmem:[%s1063_s1 + $0x68] ss:$12 sps:$4 sm:$0xff]   ;;  %v788_v43 = vld [vmem:[%s1063_s1 + $0x80] ss:$12 sps:$4 sm:$0xff]   ;;  %v791_v45 = vld [vmem:[%s1063_s1 + $0x158] ss:$12 sps:$4 sm:$0xff]  }
   0xf   :  { %452 = vmatpush1.bf16.msra.mxu0 %v757_v15  ;;  %v784_v40 = vld [vmem:[%s1063_s1 + $0xdc] ss:$12 sps:$4 sm:$0xff]   ;;  %v789_v44 = vld [vmem:[%s1063_s1 + $0xf4] ss:$12 sps:$4 sm:$0xff]   ;;  %v793_v49 = vld [vmem:[%s1063_s1 + $0x98] ss:$12 sps:$4 sm:$0xff]  }
  0x10   :  { %495 = vmatpush1.bf16.msra.mxu1 %v758_v16  ;;  %453 = vmatprep.subr.bf16.mxu0 %v759_v17  ;;  %v792_v46 = vld [vmem:[%s1063_s1 + $0xf0] ss:$12 sps:$4 sm:$0xff]   ;;  %v16_v47 = vld [vmem:[%s1064_s0 + $0x8] sm:$0xff]  ;;  %v19_v48 = vld [vmem:[%s1064_s0 + $0x20] sm:$0xff]  ;;  %v107_v17 = vshrl.u32 %v106_v11, 7 }
  0x11   :  { %685 = vmatprep.subr.bf16.mxu1 %v761_v18  ;;  %v794_v50 = vld [vmem:[%s1063_s1 + $0x10c] ss:$12 sps:$4 sm:$0xff]   ;;  %v22_v51 = vpack.c.bf16 %v19_v48, %v16_v47  ;;  %v796_v52 = vld [vmem:[%s1063_s1 + $0x170] ss:$12 sps:$4 sm:$0xff]   ;;  %v797_v53 = vld [vmem:[%s1063_s1 + $0x108] ss:$12 sps:$4 sm:$0xff]  }
  0x12   :  { %v798_v54 = vld [vmem:[%s1063_s1 + $0xb0] ss:$12 sps:$4 sm:$0xff]   ;;  %v15_v55 = vld [vmem:[%s1064_s0] sm:$0xff]  ;;  %v802_v60 = vld [vmem:[%s1063_s1 + $0x188] ss:$12 sps:$4 sm:$0xff]   ;;  %v116_v19 = vsub.s32 2, %v107_v17 }
  0x13   :  { %683 = vmatmul.mubr.msk.bf16.vlgmr.msra.gmra.mrb[0].mxu1 %vm441_vm0, %v901_v22  ;;  %454 = vmatpush1.bf16.msra.mxu0 %v762_v21  ;;  %v18_v56 = vld [vmem:[%s1064_s0 + $0x18] sm:$0xff]  ;;  %v799_v57 = vld [vmem:[%s1063_s1 + $0x124] ss:$12 sps:$4 sm:$0xff]   ;;  %v801_v59 = vld [vmem:[%s1063_s1 + $0x120] ss:$12 sps:$4 sm:$0xff]   ;;  %v108_v21 = vsub.s32 0, %v107_v17 }
  0x14   :  { %686 = vmatpush3.bf16.msra.mxu1 %v763_v23  ;;  %455 = vmatprep.subr.bf16.mxu0 %v764_v24  ;;  %v21_v58 = vpack.c.bf16 %v18_v56, %v15_v55  ;;  %v803_v62 = vld [vmem:[%s1063_s1 + $0x13c] ss:$12 sps:$4 sm:$0xff]   ;;  %v805_v63 = vld [vmem:[%s1063_s1 + $0x138] ss:$12 sps:$4 sm:$0xff]   ;;  %v806_v0 = vld [vmem:[%s1063_s1 + $0x1a0] ss:$12 sps:$4 sm:$0xff]  }
  0x15   :  { %687 = vmatprep.subr.bf16.mxu1 %v766_v25  ;;  %563 = vmatprep.mubr.bf16.mxu1 %v22_v51  ;;  %v807_v1 = vld [vmem:[%s1063_s1 + $0x154] ss:$12 sps:$4 sm:$0xff]   ;;  %v809_v2 = vld [vmem:[%s1063_s1 + $0x150] ss:$12 sps:$4 sm:$0xff]   ;;  %v810_v3 = vld [vmem:[%s1063_s1 + $0x1b8] ss:$12 sps:$4 sm:$0xff]  }
  0x16   :  { %477 = vmatprep.mubr.bf16.mxu0 %v22_v51  ;;  %v811_v4 = vld [vmem:[%s1063_s1 + $0x16c] ss:$12 sps:$4 sm:$0xff]   ;;  %v813_v5 = vld [vmem:[%s1063_s1 + $0x168] ss:$12 sps:$4 sm:$0xff]   ;;  %v814_v6 = vld [vmem:[%s1063_s1 + $0x1d0] ss:$12 sps:$4 sm:$0xff]  }
  0x17   :  { %456 = vmatpush1.bf16.msra.mxu0 %v767_v26  ;;  %v104_v20 = vld [vmem:[%s1065_s2] sm:$0x7]  ;;  %v112_v23 = vsub.s32 1, %v107_v17 }
  0x18   :  { %688 = vmatpush3.bf16.msra.mxu1 %v768_v27  ;;  %457 = vmatprep.subr.bf16.mxu0 %v769_v28  ;;  %v109_v24 = vrot.slane %v104_v20, %v108_v21 }
  0x19   :  { %689 = vmatprep.subr.bf16.mxu1 %v771_v29  ;;  %v113_v25 = vrot.slane %v104_v20, %v112_v23 }
  0x1b   :  { %458 = vmatpush1.bf16.msra.mxu0 %v772_v30 }
  0x1c   :  { %690 = vmatpush3.bf16.msra.mxu1 %v773_v31  ;;  %459 = vmatprep.subr.bf16.mxu0 %v774_v32 }
  0x1d   :  { %691 = vmatprep.subr.bf16.mxu1 %v776_v33 }
  0x1f   :  { %460 = vmatpush1.bf16.msra.mxu0 %v777_v34 }
  0x20   :  { %692 = vmatpush3.bf16.msra.mxu1 %v778_v35  ;;  %461 = vmatprep.subr.bf16.mxu0 %v779_v36 }
  0x21   :  { %693 = vmatprep.subr.bf16.mxu1 %v781_v37 }
  0x23   :  { %462 = vmatpush1.bf16.msra.mxu0 %v782_v38 }
  0x24   :  { %694 = vmatpush3.bf16.msra.mxu1 %v783_v39  ;;  %463 = vmatprep.subr.bf16.mxu0 %v784_v40 }
  0x25   :  { %695 = vmatprep.subr.bf16.mxu1 %v786_v41 }
  0x27   :  { %464 = vmatpush1.bf16.msra.mxu0 %v787_v42 }
  0x28   :  { %696 = vmatpush3.bf16.msra.mxu1 %v788_v43  ;;  %465 = vmatprep.subr.bf16.mxu0 %v789_v44 }
  0x29   :  { %697 = vmatprep.subr.bf16.mxu1 %v791_v45 }
  0x2b   :  { %466 = vmatpush1.bf16.msra.mxu0 %v792_v46 }
  0x2c   :  { %698 = vmatpush3.bf16.msra.mxu1 %v793_v49  ;;  %467 = vmatprep.subr.bf16.mxu0 %v794_v50 }
  0x2d   :  { %699 = vmatprep.subr.bf16.mxu1 %v796_v52 }
  0x2f   :  { %468 = vmatpush1.bf16.msra.mxu0 %v797_v53 }
  0x30   :  { %700 = vmatpush3.bf16.msra.mxu1 %v798_v54  ;;  %469 = vmatprep.subr.bf16.mxu0 %v799_v57 }
  0x31   :  { %712 = vmatprep.subr.bf16.mxu1 %v816_v61 }
  0x33   :  { %564 = vmatmul.mubr.bf16.vlgmr.msra.gmra.mrb[4].mxu1 %v21_v58  ;;  %470 = vmatpush1.bf16.msra.mxu0 %v801_v59 }
  0x34   :  { %713 = vmatpush3.bf16.msra.mxu1 %v802_v60  ;;  %471 = vmatprep.subr.bf16.mxu0 %v803_v62 }
  0x35   :  { %714 = vmatprep.subr.bf16.mxu1 %v816_v61  ;;  %720 = vmatprep.mubr.msk.bf16.mxu1 %vm817_vm1, %v816_v61 }
  0x37   :  { %472 = vmatpush1.bf16.msra.mxu0 %v805_v63 }
  0x38   :  { %715 = vmatpush3.bf16.msra.mxu1 %v806_v0  ;;  %473 = vmatprep.subr.bf16.mxu0 %v807_v1 }
  0x39   :  { %716 = vmatprep.subr.bf16.mxu1 %v816_v61 }
  0x3b   :  { %474 = vmatpush1.bf16.msra.mxu0 %v809_v2 }
  0x3c   :  { %717 = vmatpush3.bf16.msra.mxu1 %v810_v3  ;;  %475 = vmatprep.subr.bf16.mxu0 %v811_v4 }
  0x3d   :  { %718 = vmatprep.subr.bf16.mxu1 %v816_v61 }
  0x3f   :  { %476 = vmatpush1.bf16.msra.mxu0 %v813_v5 }
  0x40   :  { %719 = vmatpush3.bf16.msra.mxu1 %v814_v6 }
  0x42   :  { %478 = vmatmul.mubr.bf16.vlgmr.msra.gmra.mrb[0].mxu0 %v21_v58 }
  0x43   :  { %721 = vmatmul.mubr.msk.bf16.vlgmr.msra.gmra.mrb[8].mxu1 %vm441_vm0, %v901_v22  ;;  %v117_v22 = vrot.slane %v104_v20, %v116_v19 }
  0xe6   :  { %v522_v7 = vpop.f32.mrb[0].mxu1 }
  0xe7   :  { %v524_v8 = vpop.f32.mrb[1].mxu1 }
  0xe8   :  { %v526_v9 = vpop.f32.mrb[2].mxu1 }
  0xe9   :  { %v528_v10 = vpop.f32.mrb[3].mxu1 }
 0x106   :  { %v701_v12 = vpop.f32.mrb[4].mxu1 }
 0x107   :  { %v702_v13 = vpop.f32.mrb[5].mxu1 }
 0x108   :  { %v703_v14 = vadd.f32 %v702_v13, %v701_v12  ;;  %v704_v15 = vpop.f32.mrb[6].mxu1 }
 0x109   :  { %v705_v16 = vpop.f32.mrb[7].mxu1 }
 0x10a   :  { %v706_v18 = vadd.f32 %v705_v16, %v704_v15  ;;  %v566_v26 = vadd.f32 %v703_v14, %v117_v22 }
 0x10c   :  { %v569_v33 = vadd.f32 %v706_v18, %v117_v22 }
 0x115   :  { %v479_v27 = vpop.f32.mrb[0].mxu0 }
 0x116   :  { %v606_v28 = vpop.f32.mrb[8].mxu1  ;;  %v480_v29 = vadd.f32 %v479_v27, %v109_v24  ;;  %v481_v31 = vpop.f32.mrb[1].mxu0 }
 0x117   :  { %v607_v30 = vadd.f32 %v606_v28, %v566_v26  ;;  %v722_v32 = vpop.f32.mrb[9].mxu1  ;;  %v482_v34 = vadd.f32 %v481_v31, %v113_v25  ;;  %v483_v35 = vpop.f32.mrb[2].mxu0 }
 0x118   :  { %v609_v36 = vpop.f32.mrb[10].mxu1  ;;  %v523_v37 = vadd.f32 %v522_v7, %v480_v29  ;;  %v484_v38 = vadd.f32 %v483_v35, %v109_v24  ;;  %v485_v40 = vpop.f32.mrb[3].mxu0 }
 0x119   :  { %615 = vst [vmem:[%s1066_s3 + $0x10] sm:$0xff] %v607_v30  ;;  %v610_v39 = vadd.f32 %v609_v36, %v569_v33  ;;  %v723_v41 = vpop.f32.mrb[11].mxu1  ;;  %v525_v42 = vadd.f32 %v524_v8, %v482_v34  ;;  %v486_v43 = vadd.f32 %v485_v40, %v113_v25 }
 0x11a   :  { %613 = vst [vmem:[%s1066_s3] sm:$0xff] %v523_v37  ;;  %v527_v44 = vadd.f32 %v526_v9, %v484_v38 }
 0x11b   :  { %618 = vst [vmem:[%s1066_s3 + $0x28] sm:$0xff] %v610_v39  ;;  %614 = vst [vmem:[%s1066_s3 + $0x8] sm:$0xff] %v525_v42  ;;  %v529_v45 = vadd.f32 %v528_v10, %v486_v43 }
 0x11c   :  { %616 = vst [vmem:[%s1066_s3 + $0x18] sm:$0xff] %v527_v44 }
 0x11d   :  { %617 = vst [vmem:[%s1066_s3 + $0x20] sm:$0xff] %v529_v45 }

// kernel: transducer_forward.15
= control target key start
LH: loop header
LB: loop body
LE: loop exit
PB: predicated region body
PF: predicated region fallthrough
CT: control target
= control target key end

     0   :  { %v377_v0 = vmov 0.0   ;;  %vm378_vm0 = vmmov 0   ;;  %v379_v3 = vmov 0   ;;  %v52_v29 = vlaneseq  ;;  %s499_s1 = inlined_call_operand.vmem [shape: bf16[128,384], index: 1, kind: input, shape index: {}]   ;;  %s500_s0 = inlined_call_operand.vmem [shape: f32[16,128], index: 0, kind: input, shape index: {}]   ;;  %s501_s2 = inlined_call_operand.vmem [shape: f32[1,384], index: 2, kind: input, shape index: {}]   ;;  %s502_s3 = inlined_call_operand.vmem [shape: f32[16,384], index: 3, kind: output, shape index: {}]  }
   0x1   :  { %322 = vmatprep.subr.bf16.mxu1 %v377_v0  ;;  %v345_v1 = vld [vmem:[%s499_s1 + $0x4] ss:$12 sps:$4 sm:$0xff]   ;;  %338 = vmatprep.mubr.msk.bf16.mxu1 %vm378_vm0, %v377_v0  ;;  %v347_v2 = vld [vmem:[%s499_s1 + $0x8] ss:$12 sps:$4 sm:$0xff]   ;;  %v348_v4 = vld [vmem:[%s499_s1] ss:$12 sps:$4 sm:$0xff]  }
   0x2   :  { %227 = vmatprep.mubr.bf16.mxu0 %v379_v3  ;;  %195 = vmatprep.subr.bf16.mxu0 %v345_v1  ;;  %v349_v5 = vld [vmem:[%s499_s1 + $0x1c] ss:$12 sps:$4 sm:$0xff]   ;;  %v351_v6 = vld [vmem:[%s499_s1 + $0x20] ss:$12 sps:$4 sm:$0xff]   ;;  %v352_v7 = vld [vmem:[%s499_s1 + $0x18] ss:$12 sps:$4 sm:$0xff]  }
   0x3   :  { %323 = vmatpush3.bf16.msra.mxu1 %v347_v2  ;;  %196 = vmatpush1.bf16.msra.mxu0 %v348_v4  ;;  %v353_v8 = vld [vmem:[%s499_s1 + $0x34] ss:$12 sps:$4 sm:$0xff]   ;;  %v355_v9 = vld [vmem:[%s499_s1 + $0x38] ss:$12 sps:$4 sm:$0xff]   ;;  %v356_v10 = vld [vmem:[%s499_s1 + $0x30] ss:$12 sps:$4 sm:$0xff]  }
   0x4   :  { %324 = vmatprep.subr.bf16.mxu1 %v377_v0  ;;  %197 = vmatprep.subr.bf16.mxu0 %v349_v5  ;;  %v357_v11 = vld [vmem:[%s499_s1 + $0x4c] ss:$12 sps:$4 sm:$0xff]   ;;  %v359_v12 = vld [vmem:[%s499_s1 + $0x50] ss:$12 sps:$4 sm:$0xff]   ;;  %v360_v13 = vld [vmem:[%s499_s1 + $0x48] ss:$12 sps:$4 sm:$0xff]  }
   0x5   :  { %v361_v14 = vld [vmem:[%s499_s1 + $0x64] ss:$12 sps:$4 sm:$0xff]   ;;  %v363_v15 = vld [vmem:[%s499_s1 + $0x68] ss:$12 sps:$4 sm:$0xff]   ;;  %v364_v16 = vld [vmem:[%s499_s1 + $0x60] ss:$12 sps:$4 sm:$0xff]  }
   0x6   :  { %v365_v17 = vld [vmem:[%s499_s1 + $0x7c] ss:$12 sps:$4 sm:$0xff]   ;;  %v367_v18 = vld [vmem:[%s499_s1 + $0x80] ss:$12 sps:$4 sm:$0xff]   ;;  %v368_v19 = vld [vmem:[%s499_s1 + $0x78] ss:$12 sps:$4 sm:$0xff]  }
   0x7   :  { %325 = vmatpush3.bf16.msra.mxu1 %v351_v6  ;;  %198 = vmatpush1.bf16.msra.mxu0 %v352_v7  ;;  %v369_v20 = vld [vmem:[%s499_s1 + $0x94] ss:$12 sps:$4 sm:$0xff]   ;;  %v371_v21 = vld [vmem:[%s499_s1 + $0x98] ss:$12 sps:$4 sm:$0xff]   ;;  %v372_v22 = vld [vmem:[%s499_s1 + $0x90] ss:$12 sps:$4 sm:$0xff]  }
   0x8   :  { %326 = vmatprep.subr.bf16.mxu1 %v377_v0  ;;  %199 = vmatprep.subr.bf16.mxu0 %v353_v8  ;;  %v373_v23 = vld [vmem:[%s499_s1 + $0xac] ss:$12 sps:$4 sm:$0xff]   ;;  %v375_v24 = vld [vmem:[%s499_s1 + $0xb0] ss:$12 sps:$4 sm:$0xff]   ;;  %v15_v25 = vld [vmem:[%s500_s0] sm:$0xff]  ;;  %v53_v30 = vshrl.u32 %v52_v29, 7 }
   0x9   :  { %v16_v26 = vld [vmem:[%s500_s0 + $0x8] sm:$0xff]  ;;  %v50_v32 = vld [vmem:[%s501_s2] sm:$0x7] }
   0xa   :  { %v376_v27 = vld [vmem:[%s499_s1 + $0xa8] ss:$12 sps:$4 sm:$0xff]   ;;  %v17_v28 = vpack.c.bf16 %v16_v26, %v15_v25  ;;  %v62_v31 = vsub.s32 2, %v53_v30  ;;  %v54_v33 = vsub.s32 0, %v53_v30  ;;  %v58_v34 = vsub.s32 1, %v53_v30 }
   0xb   :  { %327 = vmatpush3.bf16.msra.mxu1 %v355_v9  ;;  %200 = vmatpush1.bf16.msra.mxu0 %v356_v10 }
   0xc   :  { %328 = vmatprep.subr.bf16.mxu1 %v377_v0  ;;  %201 = vmatprep.subr.bf16.mxu0 %v357_v11  ;;  %v63_v35 = vrot.slane %v50_v32, %v62_v31  ;;  %v55_v36 = vrot.slane %v50_v32, %v54_v33  ;;  %v59_v37 = vrot.slane %v50_v32, %v58_v34 }
   0xf   :  { %329 = vmatpush3.bf16.msra.mxu1 %v359_v12  ;;  %202 = vmatpush1.bf16.msra.mxu0 %v360_v13 }
  0x10   :  { %330 = vmatprep.subr.bf16.mxu1 %v377_v0  ;;  %203 = vmatprep.subr.bf16.mxu0 %v361_v14 }
  0x13   :  { %331 = vmatpush3.bf16.msra.mxu1 %v363_v15  ;;  %204 = vmatpush1.bf16.msra.mxu0 %v364_v16 }
  0x14   :  { %332 = vmatprep.subr.bf16.mxu1 %v377_v0  ;;  %205 = vmatprep.subr.bf16.mxu0 %v365_v17 }
  0x17   :  { %333 = vmatpush3.bf16.msra.mxu1 %v367_v18  ;;  %206 = vmatpush1.bf16.msra.mxu0 %v368_v19 }
  0x18   :  { %334 = vmatprep.subr.bf16.mxu1 %v377_v0  ;;  %207 = vmatprep.subr.bf16.mxu0 %v369_v20 }
  0x1b   :  { %335 = vmatpush3.bf16.msra.mxu1 %v371_v21  ;;  %208 = vmatpush1.bf16.msra.mxu0 %v372_v22 }
  0x1c   :  { %336 = vmatprep.subr.bf16.mxu1 %v377_v0  ;;  %209 = vmatprep.subr.bf16.mxu0 %v373_v23 }
  0x1f   :  { %337 = vmatpush3.bf16.msra.mxu1 %v375_v24  ;;  %210 = vmatpush1.bf16.msra.mxu0 %v376_v27 }
  0x22   :  { %339 = vmatmul.mubr.bf16.vlgmr.msra.gmra.mrb[0].mxu1 %v17_v28  ;;  %228 = vmatmul.mubr.bf16.vlgmr.msra.gmra.mrb[0].mxu0 %v17_v28 }
  0xf5   :  { %v272_v38 = vpop.f32.mrb[0].mxu1  ;;  %v229_v40 = vpop.f32.mrb[0].mxu0 }
  0xf6   :  { %v273_v39 = vadd.f32 %v272_v38, %v63_v35  ;;  %v340_v41 = vpop.f32.mrb[1].mxu1  ;;  %v230_v42 = vadd.f32 %v229_v40, %v55_v36  ;;  %v231_v43 = vpop.f32.mrb[1].mxu0 }
  0xf7   :  { %v275_v44 = vpop.f32.mrb[2].mxu1  ;;  %v232_v45 = vadd.f32 %v231_v43, %v59_v37  ;;  %v233_v47 = vpop.f32.mrb[2].mxu0 }
  0xf8   :  { %281 = vst [vmem:[%s502_s3 + $0x10] sm:$0xff] %v273_v39  ;;  %v276_v46 = vadd.f32 %v275_v44, %v63_v35  ;;  %v341_v48 = vpop.f32.mrb[3].mxu1  ;;  %279 = vst [vmem:[%s502_s3] sm:$0xff] %v230_v42  ;;  %v234_v49 = vadd.f32 %v233_v47, %v55_v36  ;;  %v235_v50 = vpop.f32.mrb[3].mxu0 }
  0xf9   :  { %280 = vst [vmem:[%s502_s3 + $0x8] sm:$0xff] %v232_v45  ;;  %v236_v51 = vadd.f32 %v235_v50, %v59_v37 }
  0xfa   :  { %284 = vst [vmem:[%s502_s3 + $0x28] sm:$0xff] %v276_v46  ;;  %282 = vst [vmem:[%s502_s3 + $0x18] sm:$0xff] %v234_v49 }
  0xfb   :  { %283 = vst [vmem:[%s502_s3 + $0x20] sm:$0xff] %v236_v51 }

// kernel: transducer_forward.19
= control target key start
LH: loop header
LB: loop body
LE: loop exit
PB: predicated region body
PF: predicated region fallthrough
CT: control target
= control target key end

     0   :  { %v154_v0 = vmov 0.0   ;;  %vm155_vm0 = vmmov 0   ;;  %vm57_vm1 = vcmask 523264   ;;  %s200_s1 = inlined_call_operand.vmem [shape: bf16[64,128], index: 1, kind: input, shape index: {}]   ;;  %s201_s0 = inlined_call_operand.vmem [shape: f32[16,64], index: 0, kind: input, shape index: {}]   ;;  %s202_s2 = inlined_call_operand.vmem [shape: f32[1,128], index: 2, kind: input, shape index: {}]   ;;  %s203_s3 = inlined_call_operand.vmem [shape: bf16[16,128], index: 3, kind: output, shape index: {}]  }
   0x1   :  { %136 = vmatprep.subr.bf16.mxu0 %v154_v0  ;;  %v150_v1 = vld [vmem:[%s200_s1] sm:$0xff]   ;;  %144 = vmatprep.mubr.msk.bf16.mxu0 %vm155_vm0, %v154_v0  ;;  %v151_v2 = vld [vmem:[%s200_s1 + $0x8] sm:$0xff]   ;;  %v152_v3 = vld [vmem:[%s200_s1 + $0x10] sm:$0xff]  }
   0x2   :  { %137 = vmatpush3.bf16.msra.mxu0 %v150_v1  ;;  %v153_v4 = vld [vmem:[%s200_s1 + $0x18] sm:$0xff]   ;;  %v15_v5 = vld [vmem:[%s201_s0] sm:$0xff]  ;;  %v16_v6 = vld [vmem:[%s201_s0 + $0x8] sm:$0xff] }
   0x3   :  { %138 = vmatprep.subr.bf16.mxu0 %v154_v0  ;;  %v17_v7 = vpack.c.bf16 %v16_v6, %v15_v5  ;;  %v116_v8 = vld [vmem:[%s202_s2] ss:$0 sm:$0xff] }
   0x6   :  { %139 = vmatpush3.bf16.msra.mxu0 %v151_v2 }
   0x7   :  { %140 = vmatprep.subr.bf16.mxu0 %v154_v0 }
   0xa   :  { %141 = vmatpush3.bf16.msra.mxu0 %v152_v3 }
   0xb   :  { %142 = vmatprep.subr.bf16.mxu0 %v154_v0 }
   0xe   :  { %143 = vmatpush3.bf16.msra.mxu0 %v153_v4 }
  0x11   :  { %145 = vmatmul.mubr.msk.bf16.vlgmr.msra.gmra.mrb[0].mxu0 %vm57_vm1, %v17_v7 }
  0xe4   :  { %v95_v9 = vpop.f32.mrb[0].mxu0 }
  0xe5   :  { %v146_v10 = vpop.f32.mrb[1].mxu0  ;;  %v96_v12 = vadd.f32 %v116_v8, %v95_v9 }
  0xe6   :  { %v98_v11 = vpop.f32.mrb[2].mxu0 }
  0xe7   :  { %v99_v13 = vadd.f32 %v116_v8, %v98_v11  ;;  %v147_v14 = vpop.f32.mrb[3].mxu0 }
  0xe9   :  { %v129_v15 = vpack.c.bf16 %v99_v13, %v96_v12 }
  0xeb   :  { %130 = vst [vmem:[%s203_s3] sm:$0xff] %v129_v15  }

// kernel: transducer_forward.20
= control target key start
LH: loop header
LB: loop body
LE: loop exit
PB: predicated region body
PF: predicated region fallthrough
CT: control target
= control target key end

     0   :  { %v121_v1 = vmov 0   ;;  %vm54_vm0 = vcmask 261120   ;;  %v24_v8 = vlaneseq  ;;  %s175_s1 = inlined_call_operand.vmem [shape: bf16[32,256], index: 1, kind: input, shape index: {}]   ;;  %s176_s0 = inlined_call_operand.vmem [shape: f32[14,32], index: 0, kind: input, shape index: {}]   ;;  %s177_s2 = inlined_call_operand.vmem [shape: f32[1,256], index: 2, kind: input, shape index: {}]   ;;  %s178_s3 = inlined_call_operand.vmem [shape: f32[14,256], index: 3, kind: output, shape index: {}]  }
   0x1   :  { %v115_v0 = vld [vmem:[%s175_s1 + $0x4] ss:$8 sps:$4 sm:$0xff]   ;;  %90 = vmatprep.mubr.bf16.mxu0 %v121_v1  ;;  %v117_v2 = vld [vmem:[%s175_s1] ss:$8 sps:$4 sm:$0xff]   ;;  %v118_v3 = vld [vmem:[%s175_s1 + $0x14] ss:$8 sps:$4 sm:$0xff]  }
   0x2   :  { %58 = vmatprep.subr.bf16.mxu0 %v115_v0  ;;  %v120_v4 = vld [vmem:[%s175_s1 + $0x10] ss:$8 sps:$4 sm:$0xff]   ;;  %v15_v5 = vld [vmem:[%s176_s0] sm:$0xff]  ;;  %v16_v6 = vld [vmem:[%s176_s0 + $0x8] sm:$0x3f]  ;;  %v25_v9 = vshrl.u32 %v24_v8, 7 }
   0x3   :  { %59 = vmatpush1.bf16.msra.mxu0 %v117_v2  ;;  %v17_v7 = vpack.c.bf16 %v16_v6, %v15_v5  ;;  %v22_v11 = vld [vmem:[%s177_s2] sm:$0x3] }
   0x4   :  { %60 = vmatprep.subr.bf16.mxu0 %v118_v3  ;;  %v26_v10 = vsub.s32 0, %v25_v9  ;;  %v30_v12 = vsub.s32 1, %v25_v9 }
   0x6   :  { %v27_v13 = vrot.slane %v22_v11, %v26_v10  ;;  %v31_v14 = vrot.slane %v22_v11, %v30_v12 }
   0x7   :  { %61 = vmatpush1.bf16.msra.mxu0 %v120_v4 }
   0xa   :  { %113 = vmatmul.mubr.msk.bf16.vlgmr.msra.gmra.mrb[0].mxu0 %vm54_vm0, %v17_v7 }
  0xdd   :  { %v92_v15 = vpop.f32.mrb[0].mxu0 }
  0xde   :  { %v93_v16 = vadd.f32 %v92_v15, %v27_v13  ;;  %v94_v17 = vpop.f32.mrb[1].mxu0 }
  0xdf   :  { %v95_v18 = vadd.f32 %v94_v17, %v31_v14  ;;  %v96_v19 = vpop.f32.mrb[2].mxu0 }
  0xe0   :  { %101 = vst [vmem:[%s178_s3] sm:$0xff] %v93_v16  ;;  %v97_v20 = vadd.f32 %v96_v19, %v27_v13  ;;  %v98_v21 = vpop.f32.mrb[3].mxu0 }
  0xe1   :  { %102 = vst [vmem:[%s178_s3 + $0x8] sm:$0xff] %v95_v18  ;;  %v99_v22 = vadd.f32 %v98_v21, %v31_v14 }
  0xe2   :  { %103 = vst [vmem:[%s178_s3 + $0x10] sm:$0x3f] %v97_v20 }
  0xe3   :  { %104 = vst [vmem:[%s178_s3 + $0x18] sm:$0x3f] %v99_v22 }

// kernel: transducer_forward.21
= control target key start
LH: loop header
LB: loop body
LE: loop exit
PB: predicated region body
PF: predicated region fallthrough
CT: control target
= control target key end

     0   :  { %s585_s15 = smov 0   ;;  %s674_s0 = inlined_call_operand.vmem [shape: f32[7,2,256], index: 0, kind: input, shape index: {}]   ;;  %s675_s1 = inlined_call_operand.vmem [shape: f32[7,2,1], index: 1, kind: input, shape index: {}]   ;;  %s676_s2 = inlined_call_operand.vmem [shape: f32[64,256], index: 2, kind: input, shape index: {}]   ;;  %s677_s3 = inlined_call_operand.vmem [shape: f32[1,256], index: 3, kind: input, shape index: {}]   ;;  %s678_s4 = inlined_call_operand.vmem [shape: f32[7,2,64], index: 4, kind: output, shape index: {}]  }
   0x1 LB: > { %s488_s16 = sadd.s32 4294967295, %s553_s15   ;;  %p492_p0 = scmp.ge.s32.totalorder %s553_s15, 1  ;;  %s553_s15 = sphi %s585_s15, %s14_s15  }
   0x2   : > { %p171_p1 = scmp.lt.s32.totalorder %s553_s15, 8 }
   0x4   : > { %p172_p2 = pnand %p492_p0, %p171_p1 }
   0x5   : > { %p200_p3 = scmp.lt.s32.totalorder (!%p172_p2), %s488_s16, 6  ;;  %p497_p4 = scmp.ne.s32.totalorder (!%p172_p2), %s488_s16, 0 }
   0x6   : > { %175 = sbr.rel (%p172_p2) target bundleno = 541 (0x21d), region = 36 }
   0xd   : > { %s201_s17 = scalar_select %p200_p3, %s488_s16, 6 }
   0xe   : > { %216 = sbr.rel (%p497_p4) target bundleno = 21 (0x15), region = 40  ;;  %vm217_vm0 = vcmask (!%p497_p4), 517120   ;;  %v555_v0 = vmov (!%p497_p4), 0.0  }
   0xf   : > { %s503_s18 = sshll.u32 %s201_s17, 2  ;;  %s495_s19 = sshll.u32 %s201_s17, 1  ;;  %218 = vst.msk [vmem:[#allocation2] sm:$0x3] (!%p497_p4), %vm217_vm0, %v555_v0  ;;  %219 = vst.msk [vmem:[#allocation3] sm:$0x3] (!%p497_p4), %vm217_vm0, %v555_v0 }
  0x10   : > { %s596_s22 = scalar_lea.vmem %s674_s0, %s503_s18  ;;  %s601_s25 = scalar_lea.vmem %s675_s1, %s495_s19 }
  0x11   : > { %s606_s28 = scalar_lea.vmem %s678_s4, %s495_s19 }
  0x15 PF: > { %v224_v1 = vld [vmem:[%s676_s2 + $0x8] sm:$0xff]  ;;  %v226_v2 = vld [vmem:[%s676_s2 + $0x18] sm:$0xff]  ;;  %v223_v3 = vld [vmem:[%s676_s2] sm:$0xff]  ;;  %v320_v4 = vlaneseq  ;;  %v556_v9 = vmov 0.0   ;;  %v557_v15 = vmov 1983009808  }
  0x16   : > { %v504_v5 = vpack.c.bf16 %v226_v2, %v224_v1  ;;  %v225_v6 = vld [vmem:[%s676_s2 + $0x10] sm:$0xff]  ;;  %v228_v7 = vld [vmem:[%s676_s2 + $0x28] sm:$0xff]  ;;  %v230_v8 = vld [vmem:[%s676_s2 + $0x38] sm:$0xff]  ;;  %307 = vmatprep.mubr.f32.mxu0 %v556_v9  ;;  %v318_v16 = vunpack.c.l.s4 %v557_v15  ;;  %s558_s13 = smov 64   ;;  %vm239_vm1 = vcmask 523264   ;;  %v559_v51 = vmov 0  }
  0x17   : > { %v506_v10 = vpack.c.bf16 %v225_v6, %v223_v3  ;;  %v508_v11 = vpack.c.bf16 %v230_v8, %v228_v7  ;;  %v227_v12 = vld [vmem:[%s676_s2 + $0x20] sm:$0xff]  ;;  %v229_v13 = vld [vmem:[%s676_s2 + $0x30] sm:$0xff]  ;;  %v232_v14 = vld [vmem:[%s676_s2 + $0x48] sm:$0xff]  ;;  %v321_v17 = vshrl.u32 %v320_v4, 7  ;;  %533 = vset.pattern.permute.xlu1 %v559_v51  ;;  %534 = vset.pattern.permute.xlu0 %v559_v51  ;;  %vm405_vm2 = vcmask 517120  }
  0x18   : > { %505 = vmatprep.subr.bf16.mxu0 %v504_v5  ;;  %v234_v18 = vld [vmem:[%s676_s2 + $0x58] sm:$0xff]  ;;  %v510_v19 = vpack.c.bf16 %v229_v13, %v227_v12  ;;  %v319_v20 = vunpack.c.0.s8 %v318_v16  ;;  %v231_v22 = vld [vmem:[%s676_s2 + $0x40] sm:$0xff]  ;;  %v233_v23 = vld [vmem:[%s676_s2 + $0x50] sm:$0xff] }
  0x19   : > { %507 = vmatpush1.bf16.msra.mxu0 %v506_v10  ;;  %v512_v21 = vpack.c.bf16 %v234_v18, %v232_v14  ;;  %v644_v24 = vld [vmem:[#allocation3] sm:$0x3]  ;;  %v236_v25 = vld [vmem:[%s676_s2 + $0x68] sm:$0xff]  ;;  %v238_v26 = vld [vmem:[%s676_s2 + $0x78] sm:$0xff]  ;;  %v514_v28 = vpack.c.bf16 %v233_v23, %v231_v22  ;;  %v330_v35 = vsub.s32 0, %v321_v17  ;;  %v334_v36 = vsub.s32 1, %v321_v17 }
  0x1a   : > { %509 = vmatprep.subr.bf16.mxu0 %v508_v11  ;;  %v322_v27 = vsub.s32 %v319_v20, %v321_v17  ;;  %v516_v30 = vpack.c.bf16 %v238_v26, %v236_v25  ;;  %v235_v31 = vld [vmem:[%s676_s2 + $0x60] sm:$0xff]  ;;  %v237_v32 = vld [vmem:[%s676_s2 + $0x70] sm:$0xff] }
  0x1b   : > { %v518_v33 = vpack.c.bf16 %v237_v32, %v235_v31  ;;  %v220_v34 = vld [vmem:[#allocation2] sm:$0x3] }
  0x1c   : > { %v373_v29 = vrot.slane %v644_v24, %v322_v27  ;;  %v326_v37 = vld [vmem:[%s677_s3] sm:$0x3] }
  0x1d   : > { %511 = vmatpush1.bf16.msra.mxu0 %v510_v19  ;;  %v331_v38 = vrot.slane %v326_v37, %v330_v35  ;;  %v335_v39 = vrot.slane %v326_v37, %v334_v36  ;;  %v222_v44 = vld [vmem:[%s596_s22] sm:$0xf] }
  0x1e   : > { %513 = vmatprep.subr.bf16.mxu0 %v512_v21  ;;  %374 = vrot.lane.b32.xlu0 %v373_v29, %s558_s13  ;;  %v390_v50 = vld [vmem:[%s601_s25] sm:$0x3] }
  0x1f   : > { %v336_v41 = vcombine.low %v331_v38, %v335_v39  ;;  %v397_v58 = vsub.f32 1.0, %v390_v50 }
  0x21   : > { %515 = vmatpush1.bf16.msra.mxu0 %v514_v28  ;;  %v343_v46 = vrot.slane %v336_v41, %v322_v27 }
  0x22   : > { %517 = vmatprep.subr.bf16.mxu0 %v516_v30 }
  0x25   : > { %519 = vmatpush1.bf16.msra.mxu0 %v518_v33 }
  0x28   : > { %498 = vmatmul.mubr.msk.f32.vlgmr.msra.gmra.mrb[0].mxu0 %vm239_vm1, %v220_v34 }
  0x90   : > { %v375_v59 = vpop.permute.xlu0 %374 }
  0xfb   : > { %v309_v40 = vpop.f32.mrb[0].mxu0 }
  0xfc   : > { %v311_v42 = vpop.f32.mrb[1].mxu0 }
  0xfd   : > { %v316_v43 = vcombine.low %v309_v40, %v311_v42 }
  0xff   : > { %v323_v45 = vrot.slane %v316_v43, %v322_v27 }
 0x101   : > { %v325_v47 = vadd.f32 %v323_v45, %v222_v44 }
 0x103   : > { %v345_v48 = vadd.f32 %v343_v46, %v325_v47 }
 0x105   : > { %356 = vrot.lane.b32.xlu1 %v345_v48, %s558_s13  ;;  %v499_v49 = vmul.f32 -1.442695, %v345_v48  ;;  %v353_v52 = vrot.slane %v345_v48, 2 }
 0x107   : > { %535 = vpow2.f32 %v499_v49 }
 0x108   : > { %537 = vtanh.f32 %v353_v52 }
 0x109   : > { %393 = vperm.xlu1 %533, %v390_v50  }
 0x111   : > { %v536_v53 = vpop.eup %535 }
 0x112   : > { %v349_v54 = vadd.f32 1.0, %v536_v53  ;;  %v538_v55 = vpop.eup %537 }
 0x114   : > { %539 = vrcp.f32 %v349_v54 }
 0x11e   : > { %v540_v56 = vpop.eup %539 }
 0x11f   : > { %v378_v57 = vmul.f32 %v540_v56, %v538_v55  ;;  %v377_v60 = vmul.f32 %v540_v56, %v375_v59 }
 0x121   : > { %380 = vrot.lane.b32.xlu0 %v378_v57, %s558_s13 }
 0x125   : > { %400 = vperm.xlu0 %534, %v397_v58  }
 0x177   : > { %v357_v1 = vpop.permute.xlu1 %356 }
 0x178   : > { %v358_v2 = vrot.slane %v357_v1, 2 }
 0x17a   : > { %v500_v3 = vmul.f32 -1.442695, %v358_v2 }
 0x188   : > { %v394_v6 = vpop.permute.xlu1 %393 }
 0x193   : > { %v381_v61 = vpop.permute.xlu0 %380 }
 0x194   : > { %v383_v62 = vadd.f32 %v381_v61, %v377_v60 }
 0x196   : > { %541 = vtanh.f32 %v383_v62  ;;  %v414_v0 = vrot.slane %v383_v62, %v322_v27 }
 0x197   : > { %543 = vpow2.f32 %v500_v3 }
 0x1a0   : > { %v542_v63 = vpop.eup %541 }
 0x1a1   : > { %386 = vrot.lane.b32.xlu1 %v542_v63, %s558_s13  ;;  %v544_v4 = vpop.eup %543 }
 0x1a2   : > { %v363_v5 = vadd.f32 1.0, %v544_v4 }
 0x1a4   : > { %545 = vrcp.f32 %v363_v5  ;;  %v401_v7 = vpop.permute.xlu0 %400 }
 0x1a5   : > { %415 = vrot.lane.b32.xlu1 %v414_v0, %s558_s13  ;;  %v403_v11 = vmul.f32 %v401_v7, %v220_v34  ;;  %v419_v13 = vmul.f32 %v401_v7, %v644_v24 }
 0x1ae   : > { %v546_v8 = vpop.eup %545 }
 0x213   : > { %v387_v9 = vpop.permute.xlu1 %386 }
 0x214   : > { %v389_v10 = vmul.f32 %v546_v8, %v387_v9 }
 0x216   : > { %v396_v12 = vmul.f32 %v394_v6, %v389_v10 }
 0x217   : > { %v416_v14 = vpop.permute.xlu1 %415 }
 0x218   : > { %422 = vst.msk [vmem:[%s606_s28] sm:$0x3] %vm405_vm2, %v396_v12  ;;  %v404_v15 = vadd.f32 %v403_v11, %v396_v12  ;;  %v418_v16 = vmul.f32 %v416_v14, %v394_v6 }
 0x21a   : > { %406 = vst.msk [vmem:[#allocation2] sm:$0x3] %vm405_vm2, %v404_v15  ;;  %v420_v17 = vadd.f32 %v419_v13, %v418_v16 }
 0x21c   : > { %421 = vst.msk [vmem:[#allocation3] sm:$0x3] %vm405_vm2, %v420_v17 }
 0x21d PF: > { %s14_s15 = sadd.s32 1, %s553_s15  }
 0x21e   : > { %p11_p5 = scmp.ge.s32.totalorder %s14_s15, 9  }
 0x220   :  { %13 = sbr.rel (!%p11_p5) target bundleno = 1 (0x1), region = 73 }

// kernel: transducer_forward.22
= control target key start
LH: loop header
LB: loop body
LE: loop exit
PB: predicated region body
PF: predicated region fallthrough
CT: control target
= control target key end

     0   :  { %v155_v1 = vmov 0   ;;  %vm78_vm0 = vcmask 523264   ;;  %v28_v12 = vlaneseq  ;;  %s221_s1 = inlined_call_operand.vmem [shape: bf16[64,256], index: 1, kind: input, shape index: {}]   ;;  %s222_s0 = inlined_call_operand.vmem [shape: f32[14,64], index: 0, kind: input, shape index: {}]   ;;  %s223_s2 = inlined_call_operand.vmem [shape: f32[1,256], index: 2, kind: input, shape index: {}]   ;;  %s224_s3 = inlined_call_operand.vmem [shape: f32[14,256], index: 3, kind: output, shape index: {}]  }
   0x1   :  { %v143_v0 = vld [vmem:[%s221_s1 + $0x4] ss:$8 sps:$4 sm:$0xff]   ;;  %114 = vmatprep.mubr.bf16.mxu0 %v155_v1  ;;  %v145_v2 = vld [vmem:[%s221_s1] ss:$8 sps:$4 sm:$0xff]   ;;  %v146_v3 = vld [vmem:[%s221_s1 + $0x14] ss:$8 sps:$4 sm:$0xff]  }
   0x2   :  { %82 = vmatprep.subr.bf16.mxu0 %v143_v0  ;;  %v148_v4 = vld [vmem:[%s221_s1 + $0x10] ss:$8 sps:$4 sm:$0xff]   ;;  %v149_v5 = vld [vmem:[%s221_s1 + $0x24] ss:$8 sps:$4 sm:$0xff]   ;;  %v151_v6 = vld [vmem:[%s221_s1 + $0x20] ss:$8 sps:$4 sm:$0xff]  }
   0x3   :  { %83 = vmatpush1.bf16.msra.mxu0 %v145_v2  ;;  %v152_v7 = vld [vmem:[%s221_s1 + $0x34] ss:$8 sps:$4 sm:$0xff]   ;;  %v154_v8 = vld [vmem:[%s221_s1 + $0x30] ss:$8 sps:$4 sm:$0xff]   ;;  %v15_v9 = vld [vmem:[%s222_s0] sm:$0xff]  ;;  %v29_v13 = vshrl.u32 %v28_v12, 7 }
   0x4   :  { %84 = vmatprep.subr.bf16.mxu0 %v146_v3  ;;  %v16_v10 = vld [vmem:[%s222_s0 + $0x8] sm:$0x3f]  ;;  %v26_v15 = vld [vmem:[%s223_s2] sm:$0x3] }
   0x5   :  { %v17_v11 = vpack.c.bf16 %v16_v10, %v15_v9  ;;  %v30_v14 = vsub.s32 0, %v29_v13  ;;  %v34_v16 = vsub.s32 1, %v29_v13 }
   0x7   :  { %85 = vmatpush1.bf16.msra.mxu0 %v148_v4  ;;  %v31_v17 = vrot.slane %v26_v15, %v30_v14  ;;  %v35_v18 = vrot.slane %v26_v15, %v34_v16 }
   0x8   :  { %86 = vmatprep.subr.bf16.mxu0 %v149_v5 }
   0xb   :  { %87 = vmatpush1.bf16.msra.mxu0 %v151_v6 }
   0xc   :  { %88 = vmatprep.subr.bf16.mxu0 %v152_v7 }
   0xf   :  { %89 = vmatpush1.bf16.msra.mxu0 %v154_v8 }
  0x12   :  { %141 = vmatmul.mubr.msk.bf16.vlgmr.msra.gmra.mrb[0].mxu0 %vm78_vm0, %v17_v11 }
  0xe5   :  { %v116_v19 = vpop.f32.mrb[0].mxu0 }
  0xe6   :  { %v117_v20 = vadd.f32 %v116_v19, %v31_v17  ;;  %v118_v21 = vpop.f32.mrb[1].mxu0 }
  0xe7   :  { %v119_v22 = vadd.f32 %v118_v21, %v35_v18  ;;  %v120_v23 = vpop.f32.mrb[2].mxu0 }
  0xe8   :  { %125 = vst [vmem:[%s224_s3] sm:$0xff] %v117_v20  ;;  %v121_v24 = vadd.f32 %v120_v23, %v31_v17  ;;  %v122_v25 = vpop.f32.mrb[3].mxu0 }
  0xe9   :  { %126 = vst [vmem:[%s224_s3 + $0x8] sm:$0xff] %v119_v22  ;;  %v123_v26 = vadd.f32 %v122_v25, %v35_v18 }
  0xea   :  { %127 = vst [vmem:[%s224_s3 + $0x10] sm:$0x3f] %v121_v24 }
  0xeb   :  { %128 = vst [vmem:[%s224_s3 + $0x18] sm:$0x3f] %v123_v26 }

// kernel: transducer_forward.24
= control target key start
LH: loop header
LB: loop body
LE: loop exit
PB: predicated region body
PF: predicated region fallthrough
CT: control target
= control target key end

     0   :  { %v149_v0 = vmov 0.0   ;;  %vm150_vm0 = vmmov 0   ;;  %vm57_vm1 = vcmask 523264   ;;  %s198_s1 = inlined_call_operand.vmem [shape: bf16[64,128], index: 1, kind: input, shape index: {}]   ;;  %s199_s0 = inlined_call_operand.vmem [shape: f32[14,64], index: 0, kind: input, shape index: {}]   ;;  %s200_s2 = inlined_call_operand.vmem [shape: f32[1,128], index: 2, kind: input, shape index: {}]   ;;  %s201_s3 = inlined_call_operand.vmem [shape: bf16[14,128], index: 3, kind: output, shape index: {}]  }
   0x1   :  { %131 = vmatprep.subr.bf16.mxu0 %v149_v0  ;;  %v145_v1 = vld [vmem:[%s198_s1] sm:$0xff]   ;;  %139 = vmatprep.mubr.msk.bf16.mxu0 %vm150_vm0, %v149_v0  ;;  %v146_v2 = vld [vmem:[%s198_s1 + $0x8] sm:$0xff]   ;;  %v147_v3 = vld [vmem:[%s198_s1 + $0x10] sm:$0xff]  }
   0x2   :  { %132 = vmatpush3.bf16.msra.mxu0 %v145_v1  ;;  %v148_v4 = vld [vmem:[%s198_s1 + $0x18] sm:$0xff]   ;;  %v15_v5 = vld [vmem:[%s199_s0] sm:$0xff]  ;;  %v16_v6 = vld [vmem:[%s199_s0 + $0x8] sm:$0x3f] }
   0x3   :  { %133 = vmatprep.subr.bf16.mxu0 %v149_v0  ;;  %v17_v7 = vpack.c.bf16 %v16_v6, %v15_v5  ;;  %v116_v8 = vld [vmem:[%s200_s2] ss:$0 sm:$0xff] }
   0x6   :  { %134 = vmatpush3.bf16.msra.mxu0 %v146_v2 }
   0x7   :  { %135 = vmatprep.subr.bf16.mxu0 %v149_v0 }
   0xa   :  { %136 = vmatpush3.bf16.msra.mxu0 %v147_v3 }
   0xb   :  { %137 = vmatprep.subr.bf16.mxu0 %v149_v0 }
   0xe   :  { %138 = vmatpush3.bf16.msra.mxu0 %v148_v4 }
  0x11   :  { %140 = vmatmul.mubr.msk.bf16.vlgmr.msra.gmra.mrb[0].mxu0 %vm57_vm1, %v17_v7 }
  0xe4   :  { %v95_v9 = vpop.f32.mrb[0].mxu0 }
  0xe5   :  { %v96_v10 = vadd.f32 %v116_v8, %v95_v9  ;;  %v141_v11 = vpop.f32.mrb[1].mxu0 }
  0xe6   :  { %v98_v12 = vpop.f32.mrb[2].mxu0 }
  0xe7   :  { %v124_v13 = vpack.c.bf16 %v96_v10, %v96_v10  ;;  %v99_v14 = vadd.f32 %v116_v8, %v98_v12  ;;  %v142_v15 = vpop.f32.mrb[3].mxu0 }
  0xe9   :  { %110 = vst [vmem:[%s201_s3] sm:$0xf] %v124_v13  ;;  %v125_v16 = vpack.c.bf16 %v99_v14, %v99_v14 }
  0xeb   :  { %111 = vst [vmem:[%s201_s3 + $0x4] sm:$0x7] %v125_v16 }

// kernel: transducer_forward.25
= control target key start
LH: loop header
LB: loop body
LE: loop exit
PB: predicated region body
PF: predicated region fallthrough
CT: control target
= control target key end

     0   :  { %s972_s15 = smov 0   ;;  %s974_s16 = smov 0   ;;  %s1171_s0 = inlined_call_operand.vmem [shape: bf16[2,8,128], index: 0, kind: input, shape index: {}]   ;;  %s1172_s1 = inlined_call_operand.vmem [shape: bf16[2,8,128], index: 1, kind: input, shape index: {}]   ;;  %s1173_s2 = inlined_call_operand.vmem [shape: bf16[128,128], index: 2, kind: input, shape index: {}]   ;;  %s1174_s3 = inlined_call_operand.vmem [shape: f32[1,128], index: 3, kind: input, shape index: {}]   ;;  %s1175_s4 = inlined_call_operand.vmem [shape: bf16[2,8,7,128], index: 4, kind: output, shape index: {}]  }
   0x1   :  { %s976_s17 = smov 0  }
   0x2 LB: > { %s26_s18 = sadd.s32 1, %s939_s16  ;;  %p777_p0 = scmp.ge.s32.totalorder %s943_s17, 1  ;;  %s943_s17 = sphi %s976_s17, %s14_s17   ;;  %s939_s16 = sphi %s974_s16, %s1179_s16   ;;  %s935_s15 = sphi %s972_s15, %s1178_s15  }
   0x3   : > { %p28_p1 = scmp.ge.s32.totalorder %s26_s18, 2  ;;  %p189_p2 = scmp.lt.s32.totalorder %s943_s17, 3 }
   0x5   : > { %s1181_s18 = smov (%p28_p1, %s26_s18), 0  ;;  %p190_p3 = pnand %p777_p0, %p189_p2 }
   0x6   : > { %v881_v0 = vld [vmem:[%s1173_s2] sm:$0xff] (!%p190_p3)   ;;  %p225_p4 = scmp.lt.s32.totalorder (!%p190_p3), %s935_s15, 1  ;;  %v882_v1 = vld [vmem:[%s1173_s2 + $0x8] sm:$0xff] (!%p190_p3)   ;;  %v883_v2 = vld [vmem:[%s1173_s2 + $0x10] sm:$0xff] (!%p190_p3)   ;;  %v261_v3 = vlaneseq (!%p190_p3)  ;;  %v945_v6 = vmov (!%p190_p3), 1966171168  }
   0x7   : > { %193 = sbr.rel (%p190_p3) target bundleno = 590 (0x24e), region = 36  ;;  %815 = vmatprep.subr.bf16.mxu0 (!%p190_p3), %v881_v0  ;;  %839 = vmatprep.subr.bf16.mxu1 (!%p190_p3), %v881_v0  ;;  %v884_v4 = vld [vmem:[%s1173_s2 + $0x18] sm:$0xff] (!%p190_p3)   ;;  %v259_v7 = vunpack.c.l.s4 (!%p190_p3), %v945_v6  ;;  %v885_v9 = vld [vmem:[%s1173_s2 + $0x20] sm:$0xff] (!%p190_p3)   ;;  %v886_v13 = vld [vmem:[%s1173_s2 + $0x28] sm:$0xff] (!%p190_p3)   ;;  %v946_v55 = vmov (!%p190_p3), 0   ;;  %vm650_vm0 = vcmask (!%p190_p3), 1043456  }
   0x8   : > { %816 = vmatpush3.bf16.msra.mxu0 (!%p190_p3), %v881_v0  ;;  %847 = vmatpush3.bf16.msra.mxu1 (!%p190_p3), %v881_v0  ;;  %v262_v8 = vshrl.u32 (!%p190_p3), %v261_v3, 7  ;;  %v887_v23 = vld [vmem:[%s1173_s2 + $0x30] sm:$0xff] (!%p190_p3)   ;;  %v888_v39 = vld [vmem:[%s1173_s2 + $0x38] sm:$0xff] (!%p190_p3)   ;;  %vm651_vm1 = vsmask.f32 (!%p190_p3), 3328 }
   0x9   : > { %817 = vmatprep.subr.bf16.mxu0 (!%p190_p3), %v882_v1  ;;  %840 = vmatprep.subr.bf16.mxu1 (!%p190_p3), %v882_v1  ;;  %v260_v11 = vunpack.c.0.s8 (!%p190_p3), %v259_v7  ;;  %vm1112_vm2 = vmand (!%p190_p3), %vm650_vm0, %vm651_vm1 }
   0xa   : > { %v1016_v15 = vsub.s32 (!%p190_p3), 0, %v262_v8 }
   0xb   : > { %v263_v12 = vsub.s32 (!%p190_p3), %v260_v11, %v262_v8 }
   0xc   : > { %818 = vmatpush3.bf16.msra.mxu0 (!%p190_p3), %v882_v1  ;;  %848 = vmatpush3.bf16.msra.mxu1 (!%p190_p3), %v882_v1 }
   0xd   : > { %819 = vmatprep.subr.bf16.mxu0 (!%p190_p3), %v883_v2  ;;  %841 = vmatprep.subr.bf16.mxu1 (!%p190_p3), %v883_v2 }
   0xe   : > { %s1183_s15 = smov (!%p225_p4, %s935_s15), 1 }
   0xf   : > { %s778_s25 = sshll.u32 %s1183_s15, 2  ;;  %s802_s22 = sshll.u32 %s1183_s15, 5 }
  0x10   : > { %s231_s28 = scalar_lea.vmem %s1171_s0, %s778_s25  ;;  %820 = vmatpush3.bf16.msra.mxu0 %v883_v2  ;;  %849 = vmatpush3.bf16.msra.mxu1 %v883_v2  ;;  %s235_s13 = scalar_lea.vmem %s1172_s1, %s778_s25 }
  0x11   : > { %v782_v5 = vld.sshfl [vmem:[%s231_s28] sm:$0x33 pattern:$0x75316420]  ;;  %821 = vmatprep.subr.bf16.mxu0 %v884_v4  ;;  %842 = vmatprep.subr.bf16.mxu1 %v884_v4  ;;  %s1108_s25 = scalar_lea.vmem %s1175_s4, %s802_s22 }
  0x12   : > { %v257_v10 = vcombine.high %v782_v5, %v782_v5  ;;  %v264_v14 = vrot.slane %v782_v5, %v263_v12  ;;  %v248_v35 = vld [vmem:[%s235_s13] sm:$0xf] }
  0x14   : > { %822 = vmatpush3.bf16.msra.mxu0 %v884_v4  ;;  %850 = vmatpush3.bf16.msra.mxu1 %v884_v4  ;;  %v271_v16 = vrot.slane %v257_v10, %v263_v12  ;;  %v275_v17 = vunpack.i.h.s16 %v264_v14  ;;  %v783_v18 = vpack.i.b16 %v264_v14, %v264_v14  ;;  %v272_v21 = vcombine.high %v264_v14, %v264_v14 }
  0x15   : > { %823 = vmatprep.subr.bf16.mxu0 %v885_v9  ;;  %843 = vmatprep.subr.bf16.mxu1 %v885_v9 }
  0x16   : > { %v277_v19 = vunpack.i.h.s16 %v271_v16  ;;  %v784_v20 = vpack.i.b16 %v271_v16, %v271_v16  ;;  %v273_v22 = vcombine.high %v271_v16, %v271_v16  ;;  %v283_v24 = vpack.i.b16 %v275_v17, %v275_v17  ;;  %v787_v16 = vld [vmem:[%s1174_s3] ss:$0 sm:$0xff] }
  0x17   : > { %v293_v25 = vrot.slane %v783_v18, %v1016_v15  ;;  %v279_v28 = vunpack.i.h.s16 %v272_v21  ;;  %v785_v29 = vpack.i.b16 %v272_v21, %v272_v21 }
  0x18   : > { %824 = vmatpush3.bf16.msra.mxu0 %v885_v9  ;;  %851 = vmatpush3.bf16.msra.mxu1 %v885_v9  ;;  %v285_v26 = vpack.i.b16 %v277_v19, %v277_v19  ;;  %v301_v27 = vrot.slane %v784_v20, %v1016_v15  ;;  %v281_v30 = vunpack.i.h.s16 %v273_v22  ;;  %v297_v31 = vrot.slane %v283_v24, %v1016_v15 }
  0x19   : > { %825 = vmatprep.subr.bf16.mxu0 %v886_v13  ;;  %844 = vmatprep.subr.bf16.mxu1 %v886_v13  ;;  %v323_v32 = vpack.i.b16 %v293_v25, %v293_v25  ;;  %v786_v34 = vpack.i.b16 %v273_v22, %v273_v22  ;;  %v287_v37 = vpack.i.b16 %v279_v28, %v279_v28 }
  0x1a   : > { %v305_v33 = vrot.slane %v285_v26, %v1016_v15  ;;  %v337_v36 = vpack.i.b16 %v301_v27, %v301_v27  ;;  %v309_v38 = vrot.slane %v785_v29, %v1016_v15  ;;  %v330_v41 = vpack.i.b16 %v297_v31, %v297_v31 }
  0x1b   : > { %v328_v40 = vrot.slane %v323_v32, %v1016_v15  ;;  %v313_v44 = vrot.slane %v287_v37, %v1016_v15  ;;  %v289_v46 = vpack.i.b16 %v281_v30, %v281_v30  ;;  %v317_v50 = vrot.slane %v786_v34, %v1016_v15 }
  0x1c   : > { %826 = vmatpush3.bf16.msra.mxu0 %v886_v13  ;;  %852 = vmatpush3.bf16.msra.mxu1 %v886_v13  ;;  %v344_v42 = vpack.i.b16 %v305_v33, %v305_v33  ;;  %v342_v43 = vrot.slane %v337_v36, %v1016_v15  ;;  %v351_v45 = vpack.i.b16 %v309_v38, %v309_v38 }
  0x1d   : > { %827 = vmatprep.subr.bf16.mxu0 %v887_v23  ;;  %845 = vmatprep.subr.bf16.mxu1 %v887_v23  ;;  %v335_v47 = vrot.slane %v330_v41, %v1016_v15  ;;  %v378_v48 = vadd.bf16 %v328_v40, %v248_v35  ;;  %v358_v53 = vpack.i.b16 %v313_v44, %v313_v44 }
  0x1e   : > { %v349_v49 = vrot.slane %v344_v42, %v1016_v15  ;;  %v380_v51 = vadd.bf16 %v342_v43, %v248_v35  ;;  %v356_v52 = vrot.slane %v351_v45, %v1016_v15  ;;  %v321_v61 = vrot.slane %v289_v46, %v1016_v15 }
  0x1f   : > { %v379_v54 = vadd.bf16 %v335_v47, %v248_v35  ;;  %v386_v56 = vmax.bf16 %v946_v55, %v378_v48  ;;  %v363_v59 = vrot.slane %v358_v53, %v1016_v15  ;;  %v365_v0 = vpack.i.b16 %v317_v50, %v317_v50 }
  0x20   : > { %828 = vmatpush3.bf16.msra.mxu0 %v887_v23  ;;  %853 = vmatpush3.bf16.msra.mxu1 %v887_v23  ;;  %v381_v57 = vadd.bf16 %v349_v49, %v248_v35  ;;  %v388_v58 = vmax.bf16 %v946_v55, %v380_v51  ;;  %v382_v60 = vadd.bf16 %v356_v52, %v248_v35 }
  0x21   : > { %829 = vmatprep.subr.bf16.mxu0 %v888_v39  ;;  %846 = vmatprep.subr.bf16.mxu1 %v888_v39  ;;  %v387_v62 = vmax.bf16 %v946_v55, %v379_v54  ;;  %v383_v1 = vadd.bf16 %v363_v59, %v248_v35  ;;  %v372_v3 = vpack.i.b16 %v321_v61, %v321_v61 }
  0x22   : > { %v389_v63 = vmax.bf16 %v946_v55, %v381_v57  ;;  %v390_v2 = vmax.bf16 %v946_v55, %v382_v60  ;;  %v370_v6 = vrot.slane %v365_v0, %v1016_v15 }
  0x23   : > { %v788_v4 = vcombine.low %v386_v56, %v387_v62  ;;  %v391_v7 = vmax.bf16 %v946_v55, %v383_v1  ;;  %v377_v8 = vrot.slane %v372_v3, %v1016_v15 }
  0x24   : > { %830 = vmatpush3.bf16.msra.mxu0 %v888_v39  ;;  %854 = vmatpush3.bf16.msra.mxu1 %v888_v39  ;;  %v789_v5 = vcombine.low %v388_v58, %v389_v63  ;;  %v384_v9 = vadd.bf16 %v370_v6, %v248_v35 }
  0x25   : > { %831 = vmatprep.mubr.bf16.mxu0 %v788_v4  ;;  %v790_v10 = vcombine.low %v390_v2, %v391_v7  ;;  %v385_v11 = vadd.bf16 %v377_v8, %v248_v35 }
  0x26   : > { %v392_v12 = vmax.bf16 %v946_v55, %v384_v9 }
  0x27   : > { %832 = vmatmul.mubr.bf16.vlgmr.msra.gmra.mrb[0].mxu0 %v789_v5  ;;  %835 = vmatprep.mubr.bf16.mxu1 %v790_v10  ;;  %v393_v13 = vmax.bf16 %v946_v55, %v385_v11 }
  0x29   : > { %v791_v14 = vcombine.low %v392_v12, %v393_v13 }
  0x2b   : > { %836 = vmatmul.mubr.bf16.vlgmr.msra.gmra.mrb[0].mxu1 %v791_v14 }
  0xfa   : > { %v833_v17 = vpop.f32.mrb[0].mxu0 }
  0xfb   : > { %v1048_v18 = vadd.f32 %v833_v17, %v787_v16  ;;  %v523_v19 = vpop.f32.mrb[1].mxu0 }
  0xfc   : > { %v1050_v20 = vadd.f32 %v787_v16, %v523_v19  ;;  %v834_v15 = vpop.f32.mrb[2].mxu0 }
  0xfd   : > { %558 = vmax.xlane.f32.xlu1 %v1048_v18  ;;  %v526_v21 = vpop.f32.mrb[3].mxu0  ;;  %v1054_v22 = vadd.f32 %v834_v15, %v787_v16 }
  0xfe   : > { %554 = vmax.xlane.f32.xlu0 %v1050_v20  ;;  %v837_v23 = vpop.f32.mrb[0].mxu1  ;;  %v1062_v29 = vadd.f32 %v787_v16, %v526_v21 }
  0xff   : > { %v539_v24 = vpop.f32.mrb[1].mxu1  ;;  %v1068_v31 = vadd.f32 %v837_v23, %v787_v16 }
 0x100   : > { %v1057_v25 = vadd.f32 %v787_v16, %v539_v24  ;;  %v838_v26 = vpop.f32.mrb[2].mxu1 }
 0x101   : > { %560 = vmax.xlane.f32.xlu1 %v1054_v22  ;;  %v542_v27 = vpop.f32.mrb[3].mxu1  ;;  %v1065_v30 = vadd.f32 %v838_v26, %v787_v16 }
 0x102   : > { %v1059_v28 = vadd.f32 %v787_v16, %v542_v27  ;;  %562 = vmax.xlane.f32.xlu0 %v1057_v25  ;;  %v659_v16 = vld [vmem:[%s1108_s25 + $0x8] sm:$0xf] }
 0x105   : > { %564 = vmax.xlane.f32.xlu1 %v1059_v28 }
 0x106   : > { %556 = vmax.xlane.f32.xlu0 %v1062_v29 }
 0x109   : > { %568 = vmax.xlane.f32.xlu1 %v1065_v30 }
 0x10a   : > { %566 = vmax.xlane.f32.xlu0 %v1068_v31 }
 0x18a   : > { %v1072_v32 = vpop.xlane.xlu1 %558 }
 0x18b   : > { %v572_v33 = vsub.f32 %v1048_v18, %v1072_v32  ;;  %v1076_v34 = vpop.xlane.xlu0 %554 }
 0x18c   : > { %v570_v35 = vsub.f32 %v1050_v20, %v1076_v34 }
 0x18d   : > { %v582_v36 = vmul.f32 1.442695, %v572_v33 }
 0x18e   : > { %v578_v37 = vmul.f32 1.442695, %v570_v35  ;;  %v1080_v38 = vpop.xlane.xlu1 %560 }
 0x18f   : > { %889 = vpow2.f32 %v582_v36  ;;  %v573_v39 = vsub.f32 %v1054_v22, %v1080_v38  ;;  %v1084_v41 = vpop.xlane.xlu0 %562 }
 0x190   : > { %891 = vpow2.f32 %v578_v37  ;;  %v574_v42 = vsub.f32 %v1057_v25, %v1084_v41  ;;  %v653_v37 = vld [vmem:[%s1108_s25] sm:$0xf] }
 0x191   : > { %v584_v40 = vmul.f32 1.442695, %v573_v39 }
 0x192   : > { %v1088_v43 = vpop.xlane.xlu1 %564  ;;  %v586_v44 = vmul.f32 1.442695, %v574_v42 }
 0x193   : > { %893 = vpow2.f32 %v584_v40  ;;  %v575_v45 = vsub.f32 %v1059_v28, %v1088_v43  ;;  %v1092_v46 = vpop.xlane.xlu0 %556 }
 0x194   : > { %v571_v47 = vsub.f32 %v1062_v29, %v1092_v46  ;;  %895 = vpow2.f32 %v586_v44  ;;  %v665_v44 = vld [vmem:[%s1108_s25 + $0x10] sm:$0xf] }
 0x195   : > { %v588_v51 = vmul.f32 1.442695, %v575_v45 }
 0x196   : > { %v1096_v48 = vpop.xlane.xlu1 %568  ;;  %v580_v49 = vmul.f32 1.442695, %v571_v47 }
 0x197   : > { %v1098_v52 = vpop.xlane.xlu0 %566  ;;  %v577_v53 = vsub.f32 %v1065_v30, %v1096_v48 }
 0x198   : > { %897 = vpow2.f32 %v580_v49  ;;  %v576_v54 = vsub.f32 %v1068_v31, %v1098_v52 }
 0x199   : > { %v890_v50 = vpop.eup %889  ;;  %899 = vpow2.f32 %v588_v51  ;;  %v592_v58 = vmul.f32 1.442695, %v577_v53  ;;  %v656_v51 = vld [vmem:[%s1108_s25 + $0x4] sm:$0xf] }
 0x19a   : > { %598 = vadd.xlane.f32.xlu0 %v890_v50  ;;  %v892_v55 = vpop.eup %891  ;;  %v590_v56 = vmul.f32 1.442695, %v576_v54 }
 0x19c   : > { %901 = vpow2.f32 %v590_v56 }
 0x19d   : > { %v894_v57 = vpop.eup %893  ;;  %903 = vpow2.f32 %v592_v58 }
 0x19e   : > { %600 = vadd.xlane.f32.xlu1 %v894_v57  ;;  %594 = vadd.xlane.f32.xlu0 %v892_v55  ;;  %v896_v59 = vpop.eup %895 }
 0x1a2   : > { %602 = vadd.xlane.f32.xlu0 %v896_v59  ;;  %v898_v60 = vpop.eup %897  ;;  %v668_v59 = vld [vmem:[%s1108_s25 + $0x14] sm:$0xf] }
 0x1a3   : > { %596 = vadd.xlane.f32.xlu1 %v898_v60  ;;  %v900_v61 = vpop.eup %899 }
 0x1a6   : > { %v902_v62 = vpop.eup %901 }
 0x1a7   : > { %604 = vadd.xlane.f32.xlu1 %v900_v61  ;;  %606 = vadd.xlane.f32.xlu0 %v902_v62  ;;  %v904_v63 = vpop.eup %903  ;;  %v671_v62 = vld [vmem:[%s1108_s25 + $0x18] sm:$0xf] }
 0x1ab   : > { %608 = vadd.xlane.f32.xlu1 %v904_v63 }
 0x227   : > { %v599_v0 = vpop.xlane.xlu0 %598 }
 0x228   : > { %905 = vlog2.f32 %v599_v0 }
 0x22b   : > { %v601_v1 = vpop.xlane.xlu1 %600  ;;  %v595_v2 = vpop.xlane.xlu0 %594 }
 0x22c   : > { %907 = vlog2.f32 %v601_v1  ;;  %v674_v1 = vld [vmem:[%s1108_s25 + $0x1c] sm:$0xf] }
 0x22d   : > { %909 = vlog2.f32 %v595_v2 }
 0x22f   : > { %v603_v3 = vpop.xlane.xlu0 %602 }
 0x230   : > { %911 = vlog2.f32 %v603_v3  ;;  %v597_v5 = vpop.xlane.xlu1 %596 }
 0x231   : > { %913 = vlog2.f32 %v597_v5 }
 0x232   : > { %v906_v4 = vpop.eup %905 }
 0x233   : > { %v615_v6 = vmul.f32 0.6931472, %v906_v4 }
 0x234   : > { %v605_v9 = vpop.xlane.xlu1 %604  ;;  %v607_v10 = vpop.xlane.xlu0 %606 }
 0x235   : > { %v628_v7 = vadd.f32 %v615_v6, %v1072_v32  ;;  %915 = vlog2.f32 %v605_v9  ;;  %v662_v32 = vld [vmem:[%s1108_s25 + $0xc] sm:$0xf] }
 0x236   : > { %v908_v8 = vpop.eup %907  ;;  %917 = vlog2.f32 %v607_v10 }
 0x237   : > { %v910_v11 = vpop.eup %909  ;;  %v636_v12 = vsub.f32 %v1048_v18, %v628_v7  ;;  %v617_v13 = vmul.f32 0.6931472, %v908_v8 }
 0x238   : > { %v611_v17 = vmul.f32 0.6931472, %v910_v11  ;;  %v609_v24 = vpop.xlane.xlu1 %608 }
 0x239   : > { %v644_v19 = vpack.c.bf16 %v636_v12, %v636_v12  ;;  %v629_v15 = vadd.f32 %v617_v13, %v1080_v38  ;;  %919 = vlog2.f32 %v609_v24 }
 0x23a   : > { %v912_v21 = vpop.eup %911  ;;  %v626_v23 = vadd.f32 %v611_v17, %v1076_v34 }
 0x23b   : > { %v660_v18 = vsel %vm1112_vm2, %v644_v19, %v659_v16  ;;  %v637_v26 = vsub.f32 %v1054_v22, %v629_v15  ;;  %v619_v27 = vmul.f32 0.6931472, %v912_v21  ;;  %v914_v35 = vpop.eup %913 }
 0x23c   : > { %661 = vst [vmem:[%s1108_s25 + $0x8] sm:$0xf] %v660_v18  ;;  %v634_v33 = vsub.f32 %v1050_v20, %v626_v23  ;;  %v613_v39 = vmul.f32 0.6931472, %v914_v35 }
 0x23d   : > { %v645_v36 = vpack.c.bf16 %v637_v26, %v637_v26  ;;  %v630_v34 = vadd.f32 %v619_v27, %v1084_v41 }
 0x23e   : > { %v642_v38 = vpack.c.bf16 %v634_v33, %v634_v33  ;;  %v627_v20 = vadd.f32 %v613_v39, %v1092_v46 }
 0x23f   : > { %v663_v22 = vsel %vm1112_vm2, %v645_v36, %v662_v32  ;;  %v638_v40 = vsub.f32 %v1057_v25, %v630_v34  ;;  %v916_v45 = vpop.eup %915 }
 0x240   : > { %664 = vst [vmem:[%s1108_s25 + $0xc] sm:$0xf] %v663_v22  ;;  %v654_v42 = vsel %vm1112_vm2, %v642_v38, %v653_v37  ;;  %v918_v47 = vpop.eup %917  ;;  %v635_v49 = vsub.f32 %v1062_v29, %v627_v20  ;;  %v621_v50 = vmul.f32 0.6931472, %v916_v45 }
 0x241   : > { %655 = vst [vmem:[%s1108_s25] sm:$0xf] %v654_v42  ;;  %v646_v41 = vpack.c.bf16 %v638_v40, %v638_v40  ;;  %v623_v53 = vmul.f32 0.6931472, %v918_v47 }
 0x242   : > { %v643_v54 = vpack.c.bf16 %v635_v49, %v635_v49  ;;  %v631_v46 = vadd.f32 %v621_v50, %v1088_v43 }
 0x243   : > { %v666_v25 = vsel %vm1112_vm2, %v646_v41, %v665_v44  ;;  %v920_v55 = vpop.eup %919  ;;  %v632_v56 = vadd.f32 %v623_v53, %v1098_v52 }
 0x244   : > { %667 = vst [vmem:[%s1108_s25 + $0x10] sm:$0xf] %v666_v25  ;;  %v657_v29 = vsel %vm1112_vm2, %v643_v54, %v656_v51  ;;  %v639_v57 = vsub.f32 %v1059_v28, %v631_v46  ;;  %v625_v58 = vmul.f32 0.6931472, %v920_v55 }
 0x245   : > { %658 = vst [vmem:[%s1108_s25 + $0x4] sm:$0xf] %v657_v29  ;;  %v640_v60 = vsub.f32 %v1068_v31, %v632_v56 }
 0x246   : > { %v647_v61 = vpack.c.bf16 %v639_v57, %v639_v57  ;;  %v633_v43 = vadd.f32 %v625_v58, %v1096_v48 }
 0x247   : > { %v648_v63 = vpack.c.bf16 %v640_v60, %v640_v60 }
 0x248   : > { %v669_v52 = vsel %vm1112_vm2, %v647_v61, %v668_v59  ;;  %v641_v0 = vsub.f32 %v1065_v30, %v633_v43 }
 0x249   : > { %670 = vst [vmem:[%s1108_s25 + $0x14] sm:$0xf] %v669_v52  ;;  %v672_v28 = vsel %vm1112_vm2, %v648_v63, %v671_v62 }
 0x24a   : > { %673 = vst [vmem:[%s1108_s25 + $0x18] sm:$0xf] %v672_v28  ;;  %v649_v2 = vpack.c.bf16 %v641_v0, %v641_v0 }
 0x24c   : > { %v675_v31 = vsel %vm1112_vm2, %v649_v2, %v674_v1 }
 0x24d   : > { %676 = vst [vmem:[%s1108_s25 + $0x1c] sm:$0xf] %v675_v31 }
 0x24e PF: > { %s14_s17 = sadd.s32 1, %s943_s17   ;;  %s1178_s15 = smov %s939_s16 }
 0x24f   : > { %p11_p5 = scmp.ge.s32.totalorder %s14_s17, 4   ;;  %s1179_s16 = smov %s1181_s18 }
 0x251   :  { %13 = sbr.rel (!%p11_p5) target bundleno = 2 (0x2), region = 69 }

</bundles_post_ra>
